<compile_context>
chip_gen: v6e
topology: v6e:2x2x1
jax: 0.10.0
libtpu: 0.0.40
codegen_flags: <defaults>
</compile_context>

<pallas_src>
import functools

import jax
import jax.numpy as jnp
from jax.experimental import pallas as pl
from jax.experimental.pallas import tpu as pltpu

# Module hyper-parameters (defaults of PoolHiddenNet.__init__)
EMBEDDING_DIM = 64
H_DIM = 64
MLP_HIDDEN = 512
BOTTLENECK_DIM = 1024
SELF_STATE_DIM = 6


def _round_up(x, m):
    return ((x + m - 1) // m) * m


def _default_seq_tile():
    """256 fills v5e's 128-wide MXU and keeps >=2 seq blocks for v7x's 2 TCs at
    moderate seq; v6e's 256-wide MXU benefits from 512 (each resident weight tile
    then serves two LHS blocks)."""
    try:
        kind = jax.devices()[0].device_kind.lower()
    except Exception:
        return 256
    return 512 if "v6" in kind else 256


# ----------------------------------------------------------------------------------
# General-path kernel: grid = (seq_blocks, humans); humans is the reduction axis.
# ----------------------------------------------------------------------------------
def _pool_hidden_kernel(e_dim, x_ref, h_ref, w1_ref, b1_ref, w2_ref, b2_ref,
                        w3_ref, b3_ref, o_ref, cat_ref):
    j = pl.program_id(1)               # human index (max-pool / reduction axis)

    x = x_ref[0]                       # (TS, 2) f32 relative positions

    # spatial_embedding: Linear(2, E) + ReLU on the VPU (K=2 is a terrible MXU shape:
    # it would pad the contraction dim to 128 and force an awkward layout).
    emb = (x[:, 0:1] * w1_ref[0:1, :]
           + x[:, 1:2] * w1_ref[1:2, :]
           + b1_ref[...])
    emb = jnp.maximum(emb, 0.0)        # (TS, E) f32

    # concat([emb, hidden]) assembled in a bf16 VMEM scratch -> one K = E+H MXU pass.
    cat_ref[:, :e_dim] = emb.astype(cat_ref.dtype)
    cat_ref[:, e_dim:] = h_ref[0]      # hidden arrives already bf16

    # mlp_pre_pool layer 1: Linear(E + h_dim, 512) + ReLU
    z = jnp.dot(cat_ref[...], w2_ref[...],
                preferred_element_type=jnp.float32) + b2_ref[...]
    z = jnp.maximum(z, 0.0)            # (TS, 512) f32

    # mlp_pre_pool layer 2: Linear(512, bottleneck) + ReLU (last_relu=True)
    y = jnp.dot(z.astype(w3_ref.dtype), w3_ref[...],
                preferred_element_type=jnp.float32) + b3_ref[...]
    y = jnp.maximum(y, 0.0)            # (TS, B) f32

    # Running max over the humans grid axis; output block resident across j.
    @pl.when(j == 0)
    def _init():
        o_ref[...] = y

    @pl.when(j > 0)
    def _accum():
        o_ref[...] = jnp.maximum(o_ref[...], y)


# ----------------------------------------------------------------------------------
# Tiny-problem kernel: humans folded into the matmul M dimension, one grid step.
# Rows are ordered human-major: row = p * seq_pad + s.
# ----------------------------------------------------------------------------------
def _pool_hidden_small_kernel(pb, seq_pad, e_dim, x_ref, h_ref, w1_ref, b1_ref,
                              w2_ref, b2_ref, w3_ref, b3_ref, o_ref, cat_ref):
    x = x_ref[...]                     # (P*seq_pad, 2) f32
    emb = (x[:, 0:1] * w1_ref[0:1, :]
           + x[:, 1:2] * w1_ref[1:2, :]
           + b1_ref[...])
    emb = jnp.maximum(emb, 0.0)

    cat_ref[:, :e_dim] = emb.astype(cat_ref.dtype)
    cat_ref[:, e_dim:] = h_ref[...]

    z = jnp.dot(cat_ref[...], w2_ref[...],
                preferred_element_type=jnp.float32) + b2_ref[...]
    z = jnp.maximum(z, 0.0)

    y = jnp.dot(z.astype(w3_ref.dtype), w3_ref[...],
                preferred_element_type=jnp.float32) + b3_ref[...]
    y = jnp.maximum(y, 0.0)            # (P*seq_pad, B) f32

    # Max over humans: P sublane-aligned static slices (seq_pad % 8 == 0).
    m = y[0:seq_pad]
    for p in range(1, pb):
        m = jnp.maximum(m, y[p * seq_pad:(p + 1) * seq_pad])
    o_ref[...] = m


# ----------------------------------------------------------------------------------
# pallas_call builders
# ----------------------------------------------------------------------------------
def _run_large(x_t, h_t, w1, b1, w2, b2, w3, b3, *, ts, seq_pad, pb, dims,
               single_buffer_weights):
    e_dim, h_dim, mlp_hidden, bottleneck = dims
    wkw = ({"pipeline_mode": pl.Buffered(buffer_count=1)}
           if single_buffer_weights else {})

    grid_spec = pltpu.PrefetchScalarGridSpec(
        num_scalar_prefetch=0,
        grid=(seq_pad // ts, pb),
        in_specs=[
            pl.BlockSpec((1, ts, 2), lambda i, j: (j, i, 0)),
            pl.BlockSpec((1, ts, h_dim), lambda i, j: (j, i, 0)),
            # Weights/biases: constant block index -> DMA'd once, kept resident,
            # and (if supported) single-buffered so the 2nd buffer isn't wasted.
            pl.BlockSpec((2, e_dim), lambda i, j: (0, 0), **wkw),
            pl.BlockSpec((1, e_dim), lambda i, j: (0, 0), **wkw),
            pl.BlockSpec((e_dim + h_dim, mlp_hidden), lambda i, j: (0, 0), **wkw),
            pl.BlockSpec((1, mlp_hidden), lambda i, j: (0, 0), **wkw),
            pl.BlockSpec((mlp_hidden, bottleneck), lambda i, j: (0, 0), **wkw),
            pl.BlockSpec((1, bottleneck), lambda i, j: (0, 0), **wkw),
        ],
        out_specs=pl.BlockSpec((ts, bottleneck), lambda i, j: (i, 0)),
        scratch_shapes=[pltpu.VMEM((ts, e_dim + h_dim), jnp.bfloat16)],
    )
    return pl.pallas_call(
        functools.partial(_pool_hidden_kernel, e_dim),
        out_shape=jax.ShapeDtypeStruct((seq_pad, bottleneck), jnp.float32),
        grid_spec=grid_spec,
        compiler_params=pltpu.CompilerParams(
            # seq-block axis is independent (megacore-shardable on v7x when there
            # are >=2 blocks); humans axis is a reduction into a resident output
            # block.  (For single-block sequences on v7x a further split of the
            # bottleneck dim would keep the 2nd TC busy.)
            dimension_semantics=("parallel", "arbitrary"),
            vmem_limit_bytes=32 * 1024 * 1024),
    )(x_t, h_t, w1, b1, w2, b2, w3, b3)


def _run_small(x_flat, h_flat, w1, b1, w2, b2, w3, b3, *, pb, seq_pad, dims):
    e_dim, h_dim, mlp_hidden, bottleneck = dims
    rows = pb * seq_pad
    grid_spec = pltpu.PrefetchScalarGridSpec(
        num_scalar_prefetch=0,
        grid=(1,),
        in_specs=[
            pl.BlockSpec((rows, 2), lambda i: (0, 0)),
            pl.BlockSpec((rows, h_dim), lambda i: (0, 0)),
            pl.BlockSpec((2, e_dim), lambda i: (0, 0)),
            pl.BlockSpec((1, e_dim), lambda i: (0, 0)),
            pl.BlockSpec((e_dim + h_dim, mlp_hidden), lambda i: (0, 0)),
            pl.BlockSpec((1, mlp_hidden), lambda i: (0, 0)),
            pl.BlockSpec((mlp_hidden, bottleneck), lambda i: (0, 0)),
            pl.BlockSpec((1, bottleneck), lambda i: (0, 0)),
        ],
        out_specs=pl.BlockSpec((seq_pad, bottleneck), lambda i: (0, 0)),
        scratch_shapes=[pltpu.VMEM((rows, e_dim + h_dim), jnp.bfloat16)],
    )
    return pl.pallas_call(
        functools.partial(_pool_hidden_small_kernel, pb, seq_pad, e_dim),
        out_shape=jax.ShapeDtypeStruct((seq_pad, bottleneck), jnp.float32),
        grid_spec=grid_spec,
        compiler_params=pltpu.CompilerParams(
            dimension_semantics=("arbitrary",),
            vmem_limit_bytes=32 * 1024 * 1024),
    )(x_flat, h_flat, w1, b1, w2, b2, w3, b3)


def pool_hidden_net(state, hidden, params, *, seq_tile=None,
                    small_rows_threshold=1024):
    """state: (seq, P, joint_dim) f32; hidden: (seq, P, h_dim) f32 -> (seq, B) f32."""
    seq_len, pb, _ = state.shape
    h_dim = hidden.shape[-1]

    # Weight prep: W2/W3 are pure MXU operands -> bf16 (f32 accumulation in-kernel);
    # W1 / biases stay f32 (VPU math / bias adds).
    w1 = params["w1"].astype(jnp.float32)
    b1 = params["b1"].reshape(1, -1).astype(jnp.float32)
    w2 = params["w2"].astype(jnp.bfloat16)                 # (E + h_dim, 512), unsplit
    b2 = params["b2"].reshape(1, -1).astype(jnp.float32)
    w3 = params["w3"].astype(jnp.bfloat16)                 # (512, B)
    b3 = params["b3"].reshape(1, -1).astype(jnp.float32)

    e_dim = w1.shape[1]
    mlp_hidden = w2.shape[1]
    bottleneck = w3.shape[1]
    dims = (e_dim, h_dim, mlp_hidden, bottleneck)

    # Relative (x, y) positions of each human (the torch self_state slice is dead
    # code).  The slice / pad / transpose / bf16 cast below fuse into one HBM pass.
    inp1 = state[:, :, SELF_STATE_DIM:SELF_STATE_DIM + 2]  # (seq, P, 2) f32
    hidden_bf = hidden.astype(jnp.bfloat16)                 # halves hidden DMA

    # --- Tiny-problem path: fold humans into the matmul M dimension ---------------
    if pb * _round_up(seq_len, 8) <= small_rows_threshold:
        seq_pad = _round_up(seq_len, 8)
        if seq_pad != seq_len:
            pad = ((0, seq_pad - seq_len), (0, 0), (0, 0))
            inp1 = jnp.pad(inp1, pad)
            hidden_bf = jnp.pad(hidden_bf, pad)
        # (seq, P, f) -> (P, seq, f) -> (P*seq, f): rows grouped human-major so the
        # in-kernel max over humans is P sublane-aligned static slices.
        x_flat = jnp.transpose(inp1, (1, 0, 2)).reshape(pb * seq_pad, 2)
        h_flat = jnp.transpose(hidden_bf, (1, 0, 2)).reshape(pb * seq_pad, h_dim)
        out = _run_small(x_flat, h_flat, w1, b1, w2, b2, w3, b3,
                         pb=pb, seq_pad=seq_pad, dims=dims)
        return out[:seq_len]

    # --- General path: humans = innermost (reduction) grid axis -------------------
    if seq_tile is None:
        seq_tile = _default_seq_tile()
    ts = min(_round_up(seq_tile, 8), _round_up(seq_len, 8))
    seq_pad = _round_up(seq_len, ts)
    if seq_pad != seq_len:
        # Padded rows compute relu(bias) garbage but are sliced off below.
        pad = ((0, seq_pad - seq_len), (0, 0), (0, 0))
        inp1 = jnp.pad(inp1, pad)
        hidden_bf = jnp.pad(hidden_bf, pad)

    # (seq, P, f) -> (P, seq, f): humans become the reduction grid axis; sequence
    # rows become the matmul M dimension and arrive as contiguous, well-sized DMAs.
    x_t = jnp.transpose(inp1, (1, 0, 2))        # (P, seq_pad, 2) f32
    h_t = jnp.transpose(hidden_bf, (1, 0, 2))   # (P, seq_pad, h_dim) bf16

    try:
        out = _run_large(x_t, h_t, w1, b1, w2, b2, w3, b3, ts=ts, seq_pad=seq_pad,
                         pb=pb, dims=dims, single_buffer_weights=True)
    except Exception:
        # pl.Buffered(buffer_count=1) not supported by this jax -> default buffering.
        out = _run_large(x_t, h_t, w1, b1, w2, b2, w3, b3, ts=ts, seq_pad=seq_pad,
                         pb=pb, dims=dims, single_buffer_weights=False)
    return out[:seq_len]


def init_params(key):
    ks = jax.random.split(key, 6)
    scale = 0.05
    return {
        "w1": scale * jax.random.normal(ks[0], (2, EMBEDDING_DIM), jnp.float32),
        "b1": scale * jax.random.normal(ks[1], (EMBEDDING_DIM,), jnp.float32),
        "w2": scale * jax.random.normal(ks[2], (EMBEDDING_DIM + H_DIM, MLP_HIDDEN), jnp.float32),
        "b2": scale * jax.random.normal(ks[3], (MLP_HIDDEN,), jnp.float32),
        "w3": scale * jax.random.normal(ks[4], (MLP_HIDDEN, BOTTLENECK_DIM), jnp.float32),
        "b3": scale * jax.random.normal(ks[5], (BOTTLENECK_DIM,), jnp.float32),
    }


def reference(state, hidden, params):
    """Pure-JAX f32 reference of the torch forward."""
    seq_len, pb, _ = state.shape
    inp1 = state[:, :, SELF_STATE_DIM:SELF_STATE_DIM + 2].reshape(-1, 2)
    emb = jnp.maximum(inp1 @ params["w1"] + params["b1"], 0.0)
    emb = emb.reshape(seq_len, pb, EMBEDDING_DIM)
    inp2 = jnp.concatenate([emb, hidden], axis=2).reshape(-1, EMBEDDING_DIM + H_DIM)
    z = jnp.maximum(inp2 @ params["w2"] + params["b2"], 0.0)
    y = jnp.maximum(z @ params["w3"] + params["b3"], 0.0)
    return jnp.max(y.reshape(seq_len, pb, BOTTLENECK_DIM), axis=1)


if __name__ == "__main__":
    key = jax.random.PRNGKey(0)
    k_state, k_hidden, k_params = jax.random.split(key, 3)

    joint_dim = SELF_STATE_DIM + 7   # crowd-nav joint state: 6 self + 7 human features
    params = init_params(k_params)

    # bf16 MXU operands (W2/W3, z, hidden) vs an f32 reference -> loose tolerance.
    tol = dict(atol=3e-2, rtol=3e-2)

    # Case 1: small problem -> tiny path (humans folded into the matmul M dim).
    seq_len, n_humans = 8, 5
    state = jax.random.normal(k_state, (seq_len, n_humans, joint_dim), jnp.float32)
    hidden = jax.random.normal(k_hidden, (seq_len, n_humans, H_DIM), jnp.float32)
    out = jax.block_until_ready(pool_hidden_net(state, hidden, params))
    ref = reference(state, hidden, params)
    assert out.shape == (seq_len, BOTTLENECK_DIM)
    assert jnp.allclose(out, ref, **tol), "mismatch vs reference (case 1)"

    # Case 2: ragged seq, still the tiny path (exercises seq padding + final slice).
    seq_len2, n_humans2 = 20, 3
    state2 = jax.random.normal(jax.random.PRNGKey(1), (seq_len2, n_humans2, joint_dim), jnp.float32)
    hidden2 = jax.random.normal(jax.random.PRNGKey(2), (seq_len2, n_humans2, H_DIM), jnp.float32)
    out2 = jax.block_until_ready(pool_hidden_net(state2, hidden2, params))
    ref2 = reference(state2, hidden2, params)
    assert out2.shape == (seq_len2, BOTTLENECK_DIM)
    assert jnp.allclose(out2, ref2, **tol), "mismatch vs reference (case 2)"

    # Case 3: force the general path (multiple seq blocks, humans reduction axis,
    # ragged last block) with a tiny tile so the test stays fast.
    seq_len3, n_humans3 = 40, 3
    state3 = jax.random.normal(jax.random.PRNGKey(3), (seq_len3, n_humans3, joint_dim), jnp.float32)
    hidden3 = jax.random.normal(jax.random.PRNGKey(4), (seq_len3, n_humans3, H_DIM), jnp.float32)
    out3 = jax.block_until_ready(
        pool_hidden_net(state3, hidden3, params, seq_tile=16, small_rows_threshold=0))
    ref3 = reference(state3, hidden3, params)
    assert out3.shape == (seq_len3, BOTTLENECK_DIM)
    assert jnp.allclose(out3, ref3, **tol), "mismatch vs reference (case 3)"

    print("KERNEL_OK")
</pallas_src>

<mosaic_0001>
module attributes {stable_mosaic.version = 11 : i64} {
  func.func @_pool_hidden_small_kernel(%arg0: i32, %arg1: memref<40x2xf32, #tpu.memory_space<vmem>>, %arg2: memref<40x64xbf16, #tpu.memory_space<vmem>>, %arg3: memref<2x64xf32, #tpu.memory_space<vmem>>, %arg4: memref<1x64xf32, #tpu.memory_space<vmem>>, %arg5: memref<128x512xbf16, #tpu.memory_space<vmem>>, %arg6: memref<1x512xf32, #tpu.memory_space<vmem>>, %arg7: memref<512x1024xbf16, #tpu.memory_space<vmem>>, %arg8: memref<1x1024xf32, #tpu.memory_space<vmem>>, %arg9: memref<8x1024xf32, #tpu.memory_space<vmem>>, %arg10: memref<40x128xbf16, #tpu.memory_space<vmem>>) attributes {dimension_semantics = [#tpu.dimension_semantics<arbitrary>], iteration_bounds = array<i64: 1>, scalar_prefetch = 0 : i64, scratch_operands = 1 : i64, tpu.core_type = #tpu.core_type<tc>, window_params = [{pipeline_mode = #tpu.pipeline_mode<synchronous>, transform_indices = @transform_0, window_bounds = array<i64: 40, 2>}, {pipeline_mode = #tpu.pipeline_mode<synchronous>, transform_indices = @transform_1, window_bounds = array<i64: 40, 64>}, {pipeline_mode = #tpu.pipeline_mode<synchronous>, transform_indices = @transform_2, window_bounds = array<i64: 2, 64>}, {pipeline_mode = #tpu.pipeline_mode<synchronous>, transform_indices = @transform_3, window_bounds = array<i64: 1, 64>}, {pipeline_mode = #tpu.pipeline_mode<synchronous>, transform_indices = @transform_4, window_bounds = array<i64: 128, 512>}, {pipeline_mode = #tpu.pipeline_mode<synchronous>, transform_indices = @transform_5, window_bounds = array<i64: 1, 512>}, {pipeline_mode = #tpu.pipeline_mode<synchronous>, transform_indices = @transform_6, window_bounds = array<i64: 512, 1024>}, {pipeline_mode = #tpu.pipeline_mode<synchronous>, transform_indices = @transform_7, window_bounds = array<i64: 1, 1024>}, {pipeline_mode = #tpu.pipeline_mode<synchronous>, transform_indices = @transform_8, window_bounds = array<i64: 8, 1024>}]} {
    %c0 = arith.constant 0 : index
    %c0_0 = arith.constant 0 : index
    %0 = vector.load %arg1[%c0, %c0_0] : memref<40x2xf32, #tpu.memory_space<vmem>>, vector<40x2xf32>
    %1 = vector.extract_strided_slice %0 {offsets = [0, 0], sizes = [40, 1], strides = [1, 1]} : vector<40x2xf32> to vector<40x1xf32>
    %c0_1 = arith.constant 0 : index
    %c0_2 = arith.constant 0 : index
    %2 = vector.load %arg3[%c0_1, %c0_2] : memref<2x64xf32, #tpu.memory_space<vmem>>, vector<1x64xf32>
    %3 = vector.broadcast %1 : vector<40x1xf32> to vector<40x64xf32>
    %4 = vector.broadcast %2 : vector<1x64xf32> to vector<40x64xf32>
    %5 = arith.mulf %3, %4 : vector<40x64xf32>
    %6 = vector.extract_strided_slice %0 {offsets = [0, 1], sizes = [40, 1], strides = [1, 1]} : vector<40x2xf32> to vector<40x1xf32>
    %c1 = arith.constant 1 : index
    %c0_3 = arith.constant 0 : index
    %7 = vector.load %arg3[%c1, %c0_3] : memref<2x64xf32, #tpu.memory_space<vmem>>, vector<1x64xf32>
    %8 = vector.broadcast %6 : vector<40x1xf32> to vector<40x64xf32>
    %9 = vector.broadcast %7 : vector<1x64xf32> to vector<40x64xf32>
    %10 = arith.mulf %8, %9 : vector<40x64xf32>
    %11 = arith.addf %5, %10 : vector<40x64xf32>
    %c0_4 = arith.constant 0 : index
    %c0_5 = arith.constant 0 : index
    %12 = vector.load %arg4[%c0_4, %c0_5] : memref<1x64xf32, #tpu.memory_space<vmem>>, vector<1x64xf32>
    %13 = vector.broadcast %12 : vector<1x64xf32> to vector<40x64xf32>
    %14 = arith.addf %11, %13 : vector<40x64xf32>
    %cst = arith.constant 0.000000e+00 : f32
    %15 = vector.broadcast %cst : f32 to vector<40x64xf32>
    %16 = arith.maximumf %14, %15 : vector<40x64xf32>
    %17 = arith.truncf %16 : vector<40x64xf32> to vector<40x64xbf16>
    %c0_6 = arith.constant 0 : index
    %c0_7 = arith.constant 0 : index
    %18 = vector.load %arg10[%c0_6, %c0_7] : memref<40x128xbf16, #tpu.memory_space<vmem>>, vector<40x64xbf16>
    tpu.vector_store %arg10[%c0_6, %c0_7], %17 {strides = array<i32>} : memref<40x128xbf16, #tpu.memory_space<vmem>>, vector<40x64xbf16>,
    %c0_8 = arith.constant 0 : index
    %c0_9 = arith.constant 0 : index
    %19 = vector.load %arg2[%c0_8, %c0_9] : memref<40x64xbf16, #tpu.memory_space<vmem>>, vector<40x64xbf16>
    %c0_10 = arith.constant 0 : index
    %c64 = arith.constant 64 : index
    %20 = vector.load %arg10[%c0_10, %c64] : memref<40x128xbf16, #tpu.memory_space<vmem>>, vector<40x64xbf16>
    tpu.vector_store %arg10[%c0_10, %c64], %19 {strides = array<i32>} : memref<40x128xbf16, #tpu.memory_space<vmem>>, vector<40x64xbf16>,
    %c0_11 = arith.constant 0 : index
    %c0_12 = arith.constant 0 : index
    %21 = vector.load %arg10[%c0_11, %c0_12] : memref<40x128xbf16, #tpu.memory_space<vmem>>, vector<40x128xbf16>
    %c0_13 = arith.constant 0 : index
    %c0_14 = arith.constant 0 : index
    %22 = vector.load %arg5[%c0_13, %c0_14] : memref<128x512xbf16, #tpu.memory_space<vmem>>, vector<128x512xbf16>
    %cst_15 = arith.constant dense<0.000000e+00> : vector<40x512xf32>
    %23 = tpu.matmul %21, %22, %cst_15 {dimension_numbers = #tpu.dot_dimension_numbers<[1], [0], [0], [1], [0, 0, 1, 1], [], []>} : vector<40x128xbf16>, vector<128x512xbf16>, vector<40x512xf32> -> vector<40x512xf32>
    %c0_16 = arith.constant 0 : index
    %c0_17 = arith.constant 0 : index
    %24 = vector.load %arg6[%c0_16, %c0_17] : memref<1x512xf32, #tpu.memory_space<vmem>>, vector<1x512xf32>
    %25 = vector.broadcast %24 : vector<1x512xf32> to vector<40x512xf32>
    %26 = arith.addf %23, %25 : vector<40x512xf32>
    %cst_18 = arith.constant 0.000000e+00 : f32
    %27 = vector.broadcast %cst_18 : f32 to vector<40x512xf32>
    %28 = arith.maximumf %26, %27 : vector<40x512xf32>
    %29 = arith.truncf %28 : vector<40x512xf32> to vector<40x512xbf16>
    %c0_19 = arith.constant 0 : index
    %c0_20 = arith.constant 0 : index
    %30 = vector.load %arg7[%c0_19, %c0_20] : memref<512x1024xbf16, #tpu.memory_space<vmem>>, vector<512x1024xbf16>
    %cst_21 = arith.constant dense<0.000000e+00> : vector<40x1024xf32>
    %31 = tpu.matmul %29, %30, %cst_21 {dimension_numbers = #tpu.dot_dimension_numbers<[1], [0], [0], [1], [0, 0, 1, 1], [], []>} : vector<40x512xbf16>, vector<512x1024xbf16>, vector<40x1024xf32> -> vector<40x1024xf32>
    %c0_22 = arith.constant 0 : index
    %c0_23 = arith.constant 0 : index
    %32 = vector.load %arg8[%c0_22, %c0_23] : memref<1x1024xf32, #tpu.memory_space<vmem>>, vector<1x1024xf32>
    %33 = vector.broadcast %32 : vector<1x1024xf32> to vector<40x1024xf32>
    %34 = arith.addf %31, %33 : vector<40x1024xf32>
    %cst_24 = arith.constant 0.000000e+00 : f32
    %35 = vector.broadcast %cst_24 : f32 to vector<40x1024xf32>
    %36 = arith.maximumf %34, %35 : vector<40x1024xf32>
    %37 = vector.extract_strided_slice %36 {offsets = [0, 0], sizes = [8, 1024], strides = [1, 1]} : vector<40x1024xf32> to vector<8x1024xf32>
    %38 = vector.extract_strided_slice %36 {offsets = [8, 0], sizes = [8, 1024], strides = [1, 1]} : vector<40x1024xf32> to vector<8x1024xf32>
    %39 = arith.maximumf %37, %38 : vector<8x1024xf32>
    %40 = vector.extract_strided_slice %36 {offsets = [16, 0], sizes = [8, 1024], strides = [1, 1]} : vector<40x1024xf32> to vector<8x1024xf32>
    %41 = arith.maximumf %39, %40 : vector<8x1024xf32>
    %42 = vector.extract_strided_slice %36 {offsets = [24, 0], sizes = [8, 1024], strides = [1, 1]} : vector<40x1024xf32> to vector<8x1024xf32>
    %43 = arith.maximumf %41, %42 : vector<8x1024xf32>
    %44 = vector.extract_strided_slice %36 {offsets = [32, 0], sizes = [8, 1024], strides = [1, 1]} : vector<40x1024xf32> to vector<8x1024xf32>
    %45 = arith.maximumf %43, %44 : vector<8x1024xf32>
    %c0_25 = arith.constant 0 : index
    %c0_26 = arith.constant 0 : index
    %46 = vector.load %arg9[%c0_25, %c0_26] : memref<8x1024xf32, #tpu.memory_space<vmem>>, vector<8x1024xf32>
    tpu.vector_store %arg9[%c0_25, %c0_26], %45 {strides = array<i32>} : memref<8x1024xf32, #tpu.memory_space<vmem>>, vector<8x1024xf32>,
    return
  }
  func.func @transform_0(%arg0: i32) -> (i32, i32) {
    %c0_i32 = arith.constant 0 : i32
    %c0_i32_0 = arith.constant 0 : i32
    %c0_i32_1 = arith.constant 0 : i32
    return %c0_i32, %c0_i32_0 : i32, i32
  }
  func.func @transform_1(%arg0: i32) -> (i32, i32) {
    %c0_i32 = arith.constant 0 : i32
    %c0_i32_0 = arith.constant 0 : i32
    %c0_i32_1 = arith.constant 0 : i32
    return %c0_i32, %c0_i32_0 : i32, i32
  }
  func.func @transform_2(%arg0: i32) -> (i32, i32) {
    %c0_i32 = arith.constant 0 : i32
    %c0_i32_0 = arith.constant 0 : i32
    %c0_i32_1 = arith.constant 0 : i32
    return %c0_i32, %c0_i32_0 : i32, i32
  }
  func.func @transform_3(%arg0: i32) -> (i32, i32) {
    %c0_i32 = arith.constant 0 : i32
    %c0_i32_0 = arith.constant 0 : i32
    %c0_i32_1 = arith.constant 0 : i32
    return %c0_i32, %c0_i32_0 : i32, i32
  }
  func.func @transform_4(%arg0: i32) -> (i32, i32) {
    %c0_i32 = arith.constant 0 : i32
    %c0_i32_0 = arith.constant 0 : i32
    %c0_i32_1 = arith.constant 0 : i32
    return %c0_i32, %c0_i32_0 : i32, i32
  }
  func.func @transform_5(%arg0: i32) -> (i32, i32) {
    %c0_i32 = arith.constant 0 : i32
    %c0_i32_0 = arith.constant 0 : i32
    %c0_i32_1 = arith.constant 0 : i32
    return %c0_i32, %c0_i32_0 : i32, i32
  }
  func.func @transform_6(%arg0: i32) -> (i32, i32) {
    %c0_i32 = arith.constant 0 : i32
    %c0_i32_0 = arith.constant 0 : i32
    %c0_i32_1 = arith.constant 0 : i32
    return %c0_i32, %c0_i32_0 : i32, i32
  }
  func.func @transform_7(%arg0: i32) -> (i32, i32) {
    %c0_i32 = arith.constant 0 : i32
    %c0_i32_0 = arith.constant 0 : i32
    %c0_i32_1 = arith.constant 0 : i32
    return %c0_i32, %c0_i32_0 : i32, i32
  }
  func.func @transform_8(%arg0: i32) -> (i32, i32) {
    %c0_i32 = arith.constant 0 : i32
    %c0_i32_0 = arith.constant 0 : i32
    %c0_i32_1 = arith.constant 0 : i32
    return %c0_i32, %c0_i32_0 : i32, i32
  }
}

</mosaic_0001>

<bundles_post_ra>
// kernel: tpu_custom_call.1
= control target key start
LH: loop header
LB: loop body
LE: loop exit
PB: predicated region body
PF: predicated region fallthrough
CT: control target
= control target key end

     0   :  { %13 = vsyncpa [#allocation4], 0  ;;  %s3515_s0 = inlined_call_operand.vmem [shape: f32[40,2], index: 0, kind: input, shape index: {}]   ;;  %s3516_s1 = inlined_call_operand.vmem [shape: bf16[40,64], index: 1, kind: input, shape index: {}]   ;;  %s3517_s2 = inlined_call_operand.vmem [shape: f32[2,64], index: 2, kind: input, shape index: {}]   ;;  %s3518_s3 = inlined_call_operand.vmem [shape: f32[1,64], index: 3, kind: input, shape index: {}]   ;;  %s3519_s4 = inlined_call_operand.hbm [shape: bf16[128,512], index: 4, kind: input, shape index: {}]   ;;  %s3520_s5 = inlined_call_operand.vmem [shape: f32[1,512], index: 5, kind: input, shape index: {}]   ;;  %s3521_s6 = inlined_call_operand.hbm [shape: bf16[512,1024], index: 6, kind: input, shape index: {}]   ;;  %s3522_s7 = inlined_call_operand.vmem [shape: f32[1,1024], index: 7, kind: input, shape index: {}]   ;;  %s3523_s8 = inlined_call_operand.hbm [shape: f32[8,1024], index: 8, kind: output, shape index: {}]  }
   0x1   :  { %14 = vsyncpa [#allocation7], 0 }
   0x2   :  { %15 = vsyncpa [#allocation5], 0  ;;  %s3197_s27 = smov [#allocation3]  }
   0x3   :  { %s29_s28 = sshll.u32 %s3197_s27, 4  ;;  %s30_s28 = int_to_ptr.vmem [resolvable:$true] %s29_s28 }
   0x4   :  { %s3139_s29 = scalar_lea.vmem %s30_s28, 4096  ;;  %p3144_p1 = scmp.lt.s32.totalorder %s30_s28, %s30_s28 }
   0x5   :  { %p3140_p0 = scmp.ne.s32.totalorder %s30_s28, %s3139_s29  ;;  %p3145_p2 = scmp.lt.s32.totalorder %s3139_s29, %s3139_s29 }
   0x7   :  { %p3146_p3 = por %p3145_p2, %p3144_p1 }
   0x9   :  { %p3147_p4 = pnand %p3146_p3, %p3140_p0 }
   0xb   :  { %3150 = shalt.err (!%p3147_p4)
}
   0xc   :  { %s3198_s30 = smov 256   ;;  %s3199_s9 = smov 16  }
   0xd   :  { %35 = dma.hbm_to_vmem [thread:$0]  %s3519_s4, 4096, %s30_s28, [#allocation4], %s3198_s30, %s3198_s30, %s3199_s9  }
   0xe   :  { %s3200_s12 = smov [#allocation6]  }
   0xf   :  { %s43_s13 = sshll.u32 %s3200_s12, 4  ;;  %s44_s13 = int_to_ptr.vmem [resolvable:$true] %s43_s13 }
  0x10   :  { %s3159_s14 = scalar_lea.vmem %s44_s13, 32768  ;;  %p3164_p6 = scmp.lt.s32.totalorder %s44_s13, %s44_s13 }
  0x11   :  { %p3160_p5 = scmp.ne.s32.totalorder %s44_s13, %s3159_s14  ;;  %p3165_p7 = scmp.lt.s32.totalorder %s3159_s14, %s3159_s14 }
  0x13   :  { %p3166_p8 = por %p3165_p7, %p3164_p6 }
  0x15   :  { %p3167_p9 = pnand %p3166_p8, %p3160_p5 }
  0x17   :  { %3170 = shalt.err (!%p3167_p9)
}
  0x18   :  { %s3201_s15 = smov 512   ;;  %s3202_s16 = smov 32  }
  0x19   :  { %49 = dma.hbm_to_vmem [thread:$0]  %s3521_s6, 32768, %s44_s13, [#allocation7], %s3201_s15, %s3201_s15, %s3202_s16  }
  0x1a   :  { %3191 = dma.done.wait [#allocation4], 4096  }
  0x1b   :  { %3192 = vsyncadd [#allocation4], 4294963200 }
  0x1c   :  { %3193 = dma.done.wait [#allocation7], 32768  }
  0x1d   :  { %3194 = vsyncadd [#allocation7], 4294934528  ;;  %v3203_v0 = vmov 1   ;;  %v3204_v1 = vmov 0   ;;  %v59_v2 = vld [vmem:[%s3515_s0] sm:$0xff]  ;;  %v60_v3 = vld [vmem:[%s3515_s0 + $0x8] sm:$0xff] }
  0x1e   :  { %3075 = vset.pattern.permute.xlu1 %v3203_v0  ;;  %3074 = vset.pattern.permute.xlu0 %v3204_v1  ;;  %v179_v4 = vld [vmem:[%s3516_s1 + $0x4] sm:$0xf]  ;;  %v178_v5 = vld [vmem:[%s3516_s1] sm:$0xf]  ;;  %v3080_v6 = vld [vmem:[#allocation3 + $0xe4] ss:$16 sps:$4 sm:$0xff]  }
  0x1f   :  { %476 = vmatprep.mubr.bf16.mxu0 %v3204_v1  ;;  %537 = vmatprep.mubr.bf16.mxu1 %v3204_v1  ;;  %v3082_v7 = vld [vmem:[#allocation3 + $0xec] ss:$16 sps:$4 sm:$0xff]   ;;  %v3084_v8 = vld [vmem:[#allocation3 + $0xe0] ss:$16 sps:$4 sm:$0xff]   ;;  %v3085_v9 = vld [vmem:[#allocation3 + $0xe8] ss:$16 sps:$4 sm:$0xff]  }
  0x20   :  { %101 = vperm.xlu1 %3075, %v59_v2   ;;  %67 = vperm.xlu0 %3074, %v59_v2   ;;  %v3086_v10 = vld [vmem:[#allocation3 + $0xc4] ss:$16 sps:$4 sm:$0xff]   ;;  %v3088_v11 = vld [vmem:[#allocation3 + $0xcc] ss:$16 sps:$4 sm:$0xff]   ;;  %v3090_v12 = vld [vmem:[#allocation3 + $0xc0] ss:$16 sps:$4 sm:$0xff]  }
  0x21   :  { %444 = vmatprep.subr.bf16.mxu0 %v3080_v6  ;;  %505 = vmatprep.subr.bf16.mxu1 %v3082_v7  ;;  %v3091_v13 = vld [vmem:[#allocation3 + $0xc8] ss:$16 sps:$4 sm:$0xff]   ;;  %s3205_s25 = smov 64   ;;  %v61_v15 = vld [vmem:[%s3515_s0 + $0x10] sm:$0xff]  ;;  %v3092_v16 = vld [vmem:[#allocation3 + $0xa4] ss:$16 sps:$4 sm:$0xff]  }
  0x22   :  { %445 = vmatpush1.bf16.msra.mxu0 %v3084_v8  ;;  %506 = vmatpush1.bf16.msra.mxu1 %v3085_v9  ;;  %v62_v14 = vld [vmem:[%s3515_s0 + $0x18] sm:$0xff]  ;;  %v3094_v17 = vld [vmem:[#allocation3 + $0xac] ss:$16 sps:$4 sm:$0xff]   ;;  %v3096_v18 = vld [vmem:[#allocation3 + $0xa0] ss:$16 sps:$4 sm:$0xff]   ;;  %vm172_vm0 = vcmask 519168  }
  0x23   :  { %446 = vmatprep.subr.bf16.mxu0 %v3086_v10  ;;  %507 = vmatprep.subr.bf16.mxu1 %v3088_v11  ;;  %v3097_v19 = vld [vmem:[#allocation3 + $0xa8] ss:$16 sps:$4 sm:$0xff]   ;;  %v3098_v20 = vld [vmem:[#allocation3 + $0x84] ss:$16 sps:$4 sm:$0xff]   ;;  %v3100_v21 = vld [vmem:[#allocation3 + $0x8c] ss:$16 sps:$4 sm:$0xff]  }
  0x24   :  { %105 = vperm.xlu1 %3075, %v60_v3   ;;  %72 = vperm.xlu0 %3074, %v60_v3   ;;  %v3102_v22 = vld [vmem:[#allocation3 + $0x80] ss:$16 sps:$4 sm:$0xff]   ;;  %v3103_v23 = vld [vmem:[#allocation3 + $0x88] ss:$16 sps:$4 sm:$0xff]   ;;  %v3104_v24 = vld [vmem:[#allocation3 + $0x64] ss:$16 sps:$4 sm:$0xff]  }
  0x25   :  { %v3106_v25 = vld [vmem:[#allocation3 + $0x6c] ss:$16 sps:$4 sm:$0xff]   ;;  %v3108_v27 = vld [vmem:[#allocation3 + $0x60] ss:$16 sps:$4 sm:$0xff]   ;;  %v3109_v28 = vld [vmem:[#allocation3 + $0x68] ss:$16 sps:$4 sm:$0xff]  }
  0x26   :  { %447 = vmatpush1.bf16.msra.mxu0 %v3090_v12  ;;  %508 = vmatpush1.bf16.msra.mxu1 %v3091_v13  ;;  %v63_v26 = vld [vmem:[%s3515_s0 + $0x20] sm:$0xff]  ;;  %v3110_v29 = vld [vmem:[#allocation3 + $0x44] ss:$16 sps:$4 sm:$0xff]   ;;  %v181_v32 = vld [vmem:[%s3516_s1 + $0xc] sm:$0xf]  ;;  %vm203_vm1 = vcmask 1043968  }
  0x27   :  { %448 = vmatprep.subr.bf16.mxu0 %v3092_v16  ;;  %509 = vmatprep.subr.bf16.mxu1 %v3094_v17  ;;  %v3112_v30 = vld [vmem:[#allocation3 + $0x4c] ss:$16 sps:$4 sm:$0xff]   ;;  %v180_v31 = vld [vmem:[%s3516_s1 + $0x8] sm:$0xf]  ;;  %v3114_v33 = vld [vmem:[#allocation3 + $0x40] ss:$16 sps:$4 sm:$0xff]  }
  0x28   :  { %190 = vrot.lane.b32.xlu1 %v179_v4, %s3205_s25  ;;  %188 = vrot.lane.b32.xlu0 %v178_v5, %s3205_s25  ;;  %v3115_v34 = vld [vmem:[#allocation3 + $0x48] ss:$16 sps:$4 sm:$0xff]   ;;  %v3116_v35 = vld [vmem:[#allocation3 + $0x24] ss:$16 sps:$4 sm:$0xff]   ;;  %v3118_v36 = vld [vmem:[#allocation3 + $0x2c] ss:$16 sps:$4 sm:$0xff]  }
  0x29   :  { %3076 = vset.pattern.permute.xlu1 %v3204_v1  ;;  %v3120_v37 = vld [vmem:[#allocation3 + $0x20] ss:$16 sps:$4 sm:$0xff]   ;;  %v182_v38 = vld [vmem:[%s3516_s1 + $0x10] sm:$0xf]  ;;  %v3121_v39 = vld [vmem:[#allocation3 + $0x28] ss:$16 sps:$4 sm:$0xff]  }
  0x2a   :  { %449 = vmatpush1.bf16.msra.mxu0 %v3096_v18  ;;  %510 = vmatpush1.bf16.msra.mxu1 %v3097_v19  ;;  %v3122_v40 = vld [vmem:[#allocation3 + $0x4] ss:$16 sps:$4 sm:$0xff]   ;;  %v3124_v41 = vld [vmem:[#allocation3 + $0xc] ss:$16 sps:$4 sm:$0xff]   ;;  %v3126_v42 = vld [vmem:[#allocation3] ss:$16 sps:$4 sm:$0xff]  }
  0x2b   :  { %450 = vmatprep.subr.bf16.mxu0 %v3098_v20  ;;  %511 = vmatprep.subr.bf16.mxu1 %v3100_v21  ;;  %v3127_v43 = vld [vmem:[#allocation3 + $0x8] ss:$16 sps:$4 sm:$0xff]   ;;  %v3298_v44 = vld [vmem:[#allocation6 + $0x1c0] sm:$0xff]  ;;  %v2761_v52 = vld [vmem:[%s3517_s2 + $0x1] ss:$0 sm:$0xff] }
  0x2c   :  { %82 = vperm.xlu1 %3076, %v62_v14   ;;  %77 = vperm.xlu0 %3074, %v61_v15   ;;  %v3300_v45 = vld [vmem:[#allocation6 + $0x1e0] sm:$0xff]  ;;  %v2760_v53 = vld [vmem:[%s3517_s2] ss:$0 sm:$0xff] }
  0x2d   :  { %v3302_v46 = vld [vmem:[#allocation6 + $0x5c0] sm:$0xff]  ;;  %v2859_v47 = vcombine.low %v3298_v44, %v3300_v45  ;;  %v2860_v48 = vcombine.high %v3298_v44, %v3300_v45  ;;  %v2762_v58 = vld [vmem:[%s3518_s3] ss:$0 sm:$0xff] }
  0x2e   :  { %451 = vmatpush1.bf16.msra.mxu0 %v3102_v22  ;;  %512 = vmatpush1.bf16.msra.mxu1 %v3103_v23  ;;  %v3308_v49 = vld [vmem:[#allocation6 + $0x5e0] sm:$0xff] }
  0x2f   :  { %452 = vmatprep.subr.bf16.mxu0 %v3104_v24  ;;  %513 = vmatprep.subr.bf16.mxu1 %v3106_v25  ;;  %v2987_v50 = vcombine.low %v3302_v46, %v3308_v49  ;;  %v2988_v51 = vcombine.high %v3302_v46, %v3308_v49  ;;  %v646_v20 = vld [vmem:[#allocation6 + $0x180] sm:$0xff] }
  0x30   :  { %3078 = vset.pattern.permute.xlu1 %v3203_v0  ;;  %3077 = vset.pattern.permute.xlu0 %v3203_v0  ;;  %v650_v22 = vld [vmem:[#allocation6 + $0x1a0] sm:$0xff] }
  0x31   :  { %113 = vperm.xlu1 %3078, %v62_v14   ;;  %109 = vperm.xlu0 %3077, %v61_v15   ;;  %v774_v23 = vld [vmem:[#allocation6 + $0x580] sm:$0xff] }
  0x32   :  { %453 = vmatpush1.bf16.msra.mxu0 %v3108_v27  ;;  %514 = vmatpush1.bf16.msra.mxu1 %v3109_v28  ;;  %v778_v24 = vld [vmem:[#allocation6 + $0x5a0] sm:$0xff] }
  0x33   :  { %454 = vmatprep.subr.bf16.mxu0 %v3110_v29  ;;  %515 = vmatprep.subr.bf16.mxu1 %v3112_v30  ;;  %v634_v44 = vld [vmem:[#allocation6 + $0x120] sm:$0xff] }
  0x34   :  { %v758_v45 = vld [vmem:[#allocation6 + $0x500] sm:$0xff] }
  0x35   :  { %3079 = vset.pattern.permute.xlu1 %v3204_v1  ;;  %117 = vperm.xlu0 %3077, %v63_v26   ;;  %v762_v46 = vld [vmem:[#allocation6 + $0x520] sm:$0xff] }
  0x36   :  { %87 = vperm.xlu1 %3079, %v63_v26   ;;  %455 = vmatpush1.bf16.msra.mxu0 %v3114_v33  ;;  %v2852_v33 = vcombine.high %v646_v20, %v650_v22 }
  0x37   :  { %516 = vmatpush1.bf16.msra.mxu1 %v3115_v34  ;;  %456 = vmatprep.subr.bf16.mxu0 %v3116_v35  ;;  %v2980_v34 = vcombine.high %v774_v23, %v778_v24  ;;  %v638_v35 = vld [vmem:[#allocation6 + $0x140] sm:$0xff] }
  0x38   :  { %517 = vmatprep.subr.bf16.mxu1 %v3118_v36 }
  0x39   :  { %194 = vrot.lane.b32.xlu0 %v181_v32, %s3205_s25 }
  0x3a   :  { %192 = vrot.lane.b32.xlu1 %v180_v31, %s3205_s25  ;;  %457 = vmatpush1.bf16.msra.mxu0 %v3120_v37  ;;  %v642_v37 = vld [vmem:[#allocation6 + $0x160] sm:$0xff] }
  0x3b   :  { %518 = vmatpush1.bf16.msra.mxu1 %v3121_v39  ;;  %458 = vmatprep.subr.bf16.mxu0 %v3122_v40  ;;  %v770_v39 = vld [vmem:[#allocation6 + $0x560] sm:$0xff] }
  0x3c   :  { %519 = vmatprep.subr.bf16.mxu1 %v3124_v41 }
  0x3e   :  { %196 = vrot.lane.b32.xlu1 %v182_v38, %s3205_s25  ;;  %459 = vmatpush1.bf16.msra.mxu0 %v3126_v42  ;;  %v766_v38 = vld [vmem:[#allocation6 + $0x540] sm:$0xff] }
  0x3f   :  { %520 = vmatpush1.bf16.msra.mxu1 %v3127_v43  ;;  %2176 = vmatprep.subr.bf16.mxu0 %v2860_v48 }
  0x40   :  { %2237 = vmatprep.subr.bf16.mxu1 %v2988_v51  ;;  %v2851_v51 = vcombine.low %v646_v20, %v650_v22  ;;  %v598_v22 = vld [vmem:[#allocation6] sm:$0xff] }
  0x9b   :  { %v102_v54 = vpop.permute.xlu1 %101  ;;  %v68_v55 = vpop.permute.xlu0 %67 }
  0x9c   :  { %v124_v56 = vmul.f32 %v2761_v52, %v102_v54  ;;  %v94_v57 = vmul.f32 %v2760_v53, %v68_v55  ;;  %v2972_v54 = vcombine.high %v766_v38, %v770_v39  ;;  %v630_v55 = vld [vmem:[#allocation6 + $0x100] sm:$0xff] }
  0x9e   :  { %v129_v59 = vadd.f32 %v124_v56, %v94_v57  ;;  %v2971_v57 = vcombine.low %v766_v38, %v770_v39  ;;  %v710_v38 = vld [vmem:[#allocation6 + $0x380] sm:$0xff] }
  0x9f   :  { %v106_v60 = vpop.permute.xlu1 %105  ;;  %v73_v61 = vpop.permute.xlu0 %72  ;;  %v714_v39 = vld [vmem:[#allocation6 + $0x3a0] sm:$0xff] }
  0xa0   :  { %v141_v62 = vadd.f32 %v2762_v58, %v129_v59  ;;  %v125_v63 = vmul.f32 %v2761_v52, %v106_v60  ;;  %v95_v0 = vmul.f32 %v2760_v53, %v73_v61  ;;  %v2964_v59 = vcombine.high %v758_v45, %v762_v46  ;;  %v622_v60 = vld [vmem:[#allocation6 + $0xc0] sm:$0xff] }
  0xa1   :  { %v626_v61 = vld [vmem:[#allocation6 + $0xe0] sm:$0xff] }
  0xa2   :  { %v146_v2 = vmax.f32 %v141_v62, 0.0  ;;  %v130_v3 = vadd.f32 %v125_v63, %v95_v0  ;;  %v750_v62 = vld [vmem:[#allocation6 + $0x4c0] sm:$0xff] }
  0xa3   :  { %v189_v4 = vpop.permute.xlu0 %188  ;;  %v191_v5 = vpop.permute.xlu1 %190  ;;  %v754_v63 = vld [vmem:[#allocation6 + $0x4e0] sm:$0xff] }
  0xa4   :  { %v3059_v6 = vpack.c.bf16 %v146_v2, %v146_v2  ;;  %v142_v7 = vadd.f32 %v2762_v58, %v130_v3  ;;  %v2835_v2 = vcombine.low %v630_v55, %v634_v44  ;;  %v2963_v3 = vcombine.low %v758_v45, %v762_v46 }
  0xa6   :  { %v147_v8 = vmax.f32 %v142_v7, 0.0  ;;  %173 = vst.msk [vmem:[#allocation2] sm:$0xf] %vm172_vm0, %v3059_v6  ;;  %v614_v6 = vld [vmem:[#allocation6 + $0x80] sm:$0xff] }
  0xa7   :  { %204 = vst.msk [vmem:[#allocation2] sm:$0xf] %vm203_vm1, %v189_v4  ;;  %v78_v9 = vpop.permute.xlu0 %77  ;;  %v83_v10 = vpop.permute.xlu1 %82  ;;  %v2828_v4 = vcombine.high %v622_v60, %v626_v61  ;;  %v618_v7 = vld [vmem:[#allocation6 + $0xa0] sm:$0xff] }
  0xa8   :  { %v3060_v11 = vpack.c.bf16 %v147_v8, %v147_v8  ;;  %v97_v12 = vmul.f32 %v2760_v53, %v83_v10  ;;  %v96_v15 = vmul.f32 %v2760_v53, %v78_v9  ;;  %v742_v8 = vld [vmem:[#allocation6 + $0x480] sm:$0xff]  ;;  %v2827_v10 = vcombine.low %v622_v60, %v626_v61 }
  0xa9   :  { %v746_v9 = vld [vmem:[#allocation6 + $0x4a0] sm:$0xff] }
  0xaa   :  { %174 = vst.msk [vmem:[#allocation2 + $0x4] sm:$0xf] %vm172_vm0, %v3060_v11  ;;  %v2955_v11 = vcombine.low %v750_v62, %v754_v63  ;;  %v2947_v20 = vcombine.low %v742_v8, %v746_v9 }
  0xab   :  { %205 = vst.msk [vmem:[#allocation2 + $0x4] sm:$0xf] %vm203_vm1, %v191_v5  ;;  %v2956_v5 = vcombine.high %v750_v62, %v754_v63  ;;  %v686_v62 = vld [vmem:[#allocation6 + $0x2c0] sm:$0xff] }
  0xac   :  { %v114_v13 = vpop.permute.xlu1 %113  ;;  %v110_v14 = vpop.permute.xlu0 %109  ;;  %v690_v63 = vld [vmem:[#allocation6 + $0x2e0] sm:$0xff] }
  0xad   :  { %v127_v16 = vmul.f32 %v2761_v52, %v114_v13  ;;  %v126_v17 = vmul.f32 %v2761_v52, %v110_v14  ;;  %v2948_v13 = vcombine.high %v742_v8, %v746_v9  ;;  %v606_v14 = vld [vmem:[#allocation6 + $0x40] sm:$0xff] }
  0xae   :  { %v678_v9 = vld [vmem:[#allocation6 + $0x280] sm:$0xff] }
  0xaf   :  { %v132_v18 = vadd.f32 %v127_v16, %v97_v12  ;;  %v131_v19 = vadd.f32 %v126_v17, %v96_v15  ;;  %v2820_v12 = vcombine.high %v614_v6, %v618_v7  ;;  %v610_v15 = vld [vmem:[#allocation6 + $0x60] sm:$0xff] }
  0xb0   :  { %v118_v21 = vpop.permute.xlu0 %117  ;;  %v734_v17 = vld [vmem:[#allocation6 + $0x440] sm:$0xff] }
  0xb1   :  { %v144_v25 = vadd.f32 %v2762_v58, %v132_v18  ;;  %v143_v26 = vadd.f32 %v2762_v58, %v131_v19  ;;  %v88_v27 = vpop.permute.xlu1 %87  ;;  %v128_v28 = vmul.f32 %v2761_v52, %v118_v21  ;;  %v2979_v52 = vcombine.low %v774_v23, %v778_v24  ;;  %v738_v18 = vld [vmem:[#allocation6 + $0x460] sm:$0xff] }
  0xb2   :  { %v98_v29 = vmul.f32 %v2760_v53, %v88_v27  ;;  %v3128_v30 = vld [vmem:[#allocation2] sm:$0xff]   ;;  %v2844_v53 = vcombine.high %v638_v35, %v642_v37  ;;  %v2819_v19 = vcombine.low %v614_v6, %v618_v7  ;;  %v2940_v21 = vcombine.high %v734_v17, %v738_v18  ;;  %v602_v23 = vld [vmem:[#allocation6 + $0x20] sm:$0xff] }
  0xb3   :  { %v149_v31 = vmax.f32 %v144_v25, 0.0  ;;  %v148_v32 = vmax.f32 %v143_v26, 0.0  ;;  %477 = vmatmul.mubr.bf16.vlgmr.msra.gmra.mxu0 %v3128_v30  ;;  %538 = vmatmul.mubr.bf16.vlgmr.msra.gmra.mxu1 %v3128_v30  ;;  %v726_v24 = vld [vmem:[#allocation6 + $0x400] sm:$0xff]  ;;  %v2811_v26 = vcombine.low %v606_v14, %v610_v15  ;;  %v2939_v27 = vcombine.low %v734_v17, %v738_v18 }
  0xb4   :  { %v133_v36 = vadd.f32 %v128_v28, %v98_v29  ;;  %v195_v43 = vpop.permute.xlu0 %194  ;;  %486 = vmatprep.mubr.bf16.mxu0 %v3204_v1  ;;  %547 = vmatprep.mubr.bf16.mxu1 %v3204_v1  ;;  %v730_v25 = vld [vmem:[#allocation6 + $0x420] sm:$0xff]  ;;  %v2804_v28 = vcombine.high %v598_v22, %v602_v23  ;;  %v2891_v7 = vcombine.low %v686_v62, %v690_v63 }
  0xb5   :  { %v3062_v40 = vpack.c.bf16 %v149_v31, %v149_v31  ;;  %v3061_v41 = vpack.c.bf16 %v148_v32, %v148_v32  ;;  %v193_v42 = vpop.permute.xlu1 %192  ;;  %2177 = vmatpush1.bf16.msra.mxu0 %v2859_v47  ;;  %2238 = vmatpush1.bf16.msra.mxu1 %v2987_v50  ;;  %v2843_v50 = vcombine.low %v638_v35, %v642_v37  ;;  %v718_v30 = vld [vmem:[#allocation6 + $0x3c0] sm:$0xff] }
  0xb6   :  { %v145_v48 = vadd.f32 %v2762_v58, %v133_v36  ;;  %2178 = vmatprep.subr.bf16.mxu0 %v2852_v33  ;;  %2239 = vmatprep.subr.bf16.mxu1 %v2980_v34  ;;  %v2836_v58 = vcombine.high %v630_v55, %v634_v44  ;;  %v2932_v29 = vcombine.high %v726_v24, %v730_v25  ;;  %v722_v31 = vld [vmem:[#allocation6 + $0x3e0] sm:$0xff] }
  0xb7   :  { %176 = vst.msk [vmem:[#allocation2 + $0xc] sm:$0xf] %vm172_vm0, %v3062_v40  ;;  %175 = vst.msk [vmem:[#allocation2 + $0x8] sm:$0xf] %vm172_vm0, %v3061_v41  ;;  %v846_v32 = vld [vmem:[#allocation6 + $0x7c0] sm:$0xff]  ;;  %v2803_v34 = vcombine.low %v598_v22, %v602_v23  ;;  %v2931_v35 = vcombine.low %v726_v24, %v730_v25  ;;  %v2924_v36 = vcombine.high %v718_v30, %v722_v31 }
  0xb8   :  { %v150_v56 = vmax.f32 %v145_v48, 0.0  ;;  %206 = vst.msk [vmem:[#allocation2 + $0x8] sm:$0xf] %vm203_vm1, %v193_v42  ;;  %207 = vst.msk [vmem:[#allocation2 + $0xc] sm:$0xf] %vm203_vm1, %v195_v43  ;;  %v850_v33 = vld [vmem:[#allocation6 + $0x7e0] sm:$0xff]  ;;  %v2923_v42 = vcombine.low %v718_v30, %v722_v31  ;;  %v2916_v48 = vcombine.high %v710_v38, %v714_v39 }
  0xb9   :  { %v197_v49 = vpop.permute.xlu1 %196  ;;  %2179 = vmatpush1.bf16.msra.mxu0 %v2851_v51  ;;  %2240 = vmatpush1.bf16.msra.mxu1 %v2979_v52  ;;  %v3052_v37 = vcombine.high %v846_v32, %v850_v33  ;;  %v838_v40 = vld [vmem:[#allocation6 + $0x780] sm:$0xff]  ;;  %v3051_v43 = vcombine.low %v846_v32, %v850_v33  ;;  %v3343_v32 = vld [vmem:[#allocation6 + $0x1c8] sm:$0xff] }
  0xba   :  { %v3063_v47 = vpack.c.bf16 %v150_v56, %v150_v56  ;;  %2180 = vmatprep.subr.bf16.mxu0 %v2844_v53  ;;  %2241 = vmatprep.subr.bf16.mxu1 %v2972_v54  ;;  %v842_v41 = vld [vmem:[#allocation6 + $0x7a0] sm:$0xff]  ;;  %v2915_v56 = vcombine.low %v710_v38, %v714_v39  ;;  %v3345_v33 = vld [vmem:[#allocation6 + $0x1e8] sm:$0xff] }
  0xbb   :  { %v3044_v51 = vcombine.high %v838_v40, %v842_v41  ;;  %v702_v52 = vld [vmem:[#allocation6 + $0x340] sm:$0xff]  ;;  %v3043_v44 = vcombine.low %v838_v40, %v842_v41  ;;  %v248_v40 = vlaneseq }
  0xbc   :  { %177 = vst.msk [vmem:[#allocation2 + $0x10] sm:$0xf] %vm172_vm0, %v3063_v47  ;;  %v706_v53 = vld [vmem:[#allocation6 + $0x360] sm:$0xff] }
  0xbd   :  { %208 = vst.msk [vmem:[#allocation2 + $0x10] sm:$0xf] %vm203_vm1, %v197_v49  ;;  %2181 = vmatpush1.bf16.msra.mxu0 %v2843_v50  ;;  %2242 = vmatpush1.bf16.msra.mxu1 %v2971_v57  ;;  %v830_v54 = vld [vmem:[#allocation6 + $0x740] sm:$0xff]  ;;  %v2908_v45 = vcombine.high %v702_v52, %v706_v53  ;;  %v3359_v41 = vshrl.u32 %v248_v40, 7 }
  0xbe   :  { %2182 = vmatprep.subr.bf16.mxu0 %v2836_v58  ;;  %2243 = vmatprep.subr.bf16.mxu1 %v2964_v59  ;;  %v834_v55 = vld [vmem:[#allocation6 + $0x760] sm:$0xff]  ;;  %v2907_v58 = vcombine.low %v702_v52, %v706_v53  ;;  %v246_v52 = vld [vmem:[%s3520_s5] sm:$0xf] }
  0xbf   :  { %v3129_v0 = vld [vmem:[#allocation2 + $0x8] sm:$0xff]   ;;  %v3036_v46 = vcombine.high %v830_v54, %v834_v55  ;;  %v694_v47 = vld [vmem:[#allocation6 + $0x300] sm:$0xff]  ;;  %v3035_v59 = vcombine.low %v830_v54, %v834_v55 }
  0xc0   :  { %487 = vmatmul.mubr.bf16.gmra.mxu0 %v3129_v0  ;;  %548 = vmatmul.mubr.bf16.gmra.mxu1 %v3129_v0  ;;  %v698_v49 = vld [vmem:[#allocation6 + $0x320] sm:$0xff] }
  0xc1   :  { %496 = vmatprep.mubr.bf16.mxu0 %v3204_v1  ;;  %557 = vmatprep.mubr.bf16.mxu1 %v3204_v1  ;;  %v2812_v1 = vcombine.high %v606_v14, %v610_v15  ;;  %v822_v50 = vld [vmem:[#allocation6 + $0x700] sm:$0xff]  ;;  %v2900_v60 = vcombine.high %v694_v47, %v698_v49 }
  0xc2   :  { %2183 = vmatpush1.bf16.msra.mxu0 %v2835_v2  ;;  %2244 = vmatpush1.bf16.msra.mxu1 %v2963_v3  ;;  %v826_v57 = vld [vmem:[#allocation6 + $0x720] sm:$0xff]  ;;  %v2899_v3 = vcombine.low %v694_v47, %v698_v49 }
  0xc3   :  { %2184 = vmatprep.subr.bf16.mxu0 %v2828_v4  ;;  %2245 = vmatprep.subr.bf16.mxu1 %v2956_v5  ;;  %v3028_v61 = vcombine.high %v822_v50, %v826_v57  ;;  %v814_v0 = vld [vmem:[#allocation6 + $0x6c0] sm:$0xff]  ;;  %v3027_v4 = vcombine.low %v822_v50, %v826_v57  ;;  %v2892_v5 = vcombine.high %v686_v62, %v690_v63 }
  0xc4   :  { %v3130_v16 = vld [vmem:[#allocation2 + $0x10] ss:$0 sps:$4 sm:$0xff]   ;;  %v818_v2 = vld [vmem:[#allocation6 + $0x6e0] sm:$0xff] }
  0xc5   :  { %v3020_v6 = vcombine.high %v814_v0, %v818_v2  ;;  %v3019_v8 = vcombine.low %v814_v0, %v818_v2  ;;  %v670_v17 = vld [vmem:[#allocation6 + $0x240] sm:$0xff] }
  0xc6   :  { %2185 = vmatpush1.bf16.msra.mxu0 %v2827_v10  ;;  %2246 = vmatpush1.bf16.msra.mxu1 %v2955_v11  ;;  %v682_v10 = vld [vmem:[#allocation6 + $0x2a0] sm:$0xff] }
  0xc7   :  { %2186 = vmatprep.subr.bf16.mxu0 %v2820_v12  ;;  %2247 = vmatprep.subr.bf16.mxu1 %v2948_v13  ;;  %v806_v11 = vld [vmem:[#allocation6 + $0x680] sm:$0xff]  ;;  %v2884_v12 = vcombine.high %v678_v9, %v682_v10  ;;  %v2883_v14 = vcombine.low %v678_v9, %v682_v10 }
  0xc8   :  { %497 = vmatmul.mubr.bf16.gmra.mxu0 %v3130_v16  ;;  %558 = vmatmul.mubr.bf16.gmra.mxu1 %v3130_v16  ;;  %v810_v13 = vld [vmem:[#allocation6 + $0x6a0] sm:$0xff] }
  0xc9   :  { %v3011_v15 = vcombine.low %v806_v11, %v810_v13  ;;  %v3012_v16 = vcombine.high %v806_v11, %v810_v13  ;;  %v674_v18 = vld [vmem:[#allocation6 + $0x260] sm:$0xff]  ;;  %v779_v13 = vld [vmem:[#allocation6 + $0x5a8] sm:$0xff] }
  0xca   :  { %2187 = vmatpush1.bf16.msra.mxu0 %v2819_v19  ;;  %2248 = vmatpush1.bf16.msra.mxu1 %v2947_v20  ;;  %v798_v19 = vld [vmem:[#allocation6 + $0x640] sm:$0xff]  ;;  %v2876_v20 = vcombine.high %v670_v17, %v674_v18 }
  0xcb   :  { %2188 = vmatprep.subr.bf16.mxu0 %v2812_v1  ;;  %2249 = vmatprep.subr.bf16.mxu1 %v2940_v21  ;;  %v802_v1 = vld [vmem:[#allocation6 + $0x660] sm:$0xff]  ;;  %v2875_v21 = vcombine.low %v670_v17, %v674_v18 }
  0xcc   :  { %v3003_v22 = vcombine.low %v798_v19, %v802_v1  ;;  %v3004_v23 = vcombine.high %v798_v19, %v802_v1  ;;  %v662_v24 = vld [vmem:[#allocation6 + $0x200] sm:$0xff] }
  0xcd   :  { %v666_v25 = vld [vmem:[#allocation6 + $0x220] sm:$0xff] }
  0xce   :  { %2189 = vmatpush1.bf16.msra.mxu0 %v2811_v26  ;;  %2250 = vmatpush1.bf16.msra.mxu1 %v2939_v27  ;;  %v790_v26 = vld [vmem:[#allocation6 + $0x600] sm:$0xff]  ;;  %v2868_v27 = vcombine.high %v662_v24, %v666_v25 }
  0xcf   :  { %2190 = vmatprep.subr.bf16.mxu0 %v2804_v28  ;;  %2251 = vmatprep.subr.bf16.mxu1 %v2932_v29  ;;  %v794_v28 = vld [vmem:[#allocation6 + $0x620] sm:$0xff]  ;;  %v2867_v29 = vcombine.low %v662_v24, %v666_v25  ;;  %v767_v25 = vld [vmem:[#allocation6 + $0x548] sm:$0xff] }
  0xd0   :  { %v2995_v30 = vcombine.low %v790_v26, %v794_v28  ;;  %v2996_v31 = vcombine.high %v790_v26, %v794_v28  ;;  %v771_v26 = vld [vmem:[#allocation6 + $0x568] sm:$0xff] }
  0xd2   :  { %2191 = vmatpush1.bf16.msra.mxu0 %v2803_v34  ;;  %2252 = vmatpush1.bf16.msra.mxu1 %v2931_v35  ;;  %v3347_v34 = vld [vmem:[#allocation6 + $0x5c8] sm:$0xff]  ;;  %v2862_v35 = vcombine.high %v3343_v32, %v3345_v33 }
  0xd3   :  { %2192 = vmatprep.subr.bf16.mxu0 %v2924_v36  ;;  %2253 = vmatprep.subr.bf16.mxu1 %v3052_v37  ;;  %v3351_v36 = vld [vmem:[#allocation6 + $0x5e8] sm:$0xff]  ;;  %v2861_v37 = vcombine.low %v3343_v32, %v3345_v33 }
  0xd4   :  { %v2989_v38 = vcombine.low %v3347_v34, %v3351_v36  ;;  %v2990_v39 = vcombine.high %v3347_v34, %v3351_v36  ;;  %v3409_v36 = vld [vmem:[#allocation6 + $0x108] sm:$0xff] }
  0xd6   :  { %2193 = vmatpush2.bf16.msra.mxu0 %v2923_v42  ;;  %2254 = vmatpush2.bf16.msra.mxu1 %v3051_v43  ;;  %v254_v42 = vsub.s32 1, %v3359_v41  ;;  %v262_v43 = vsub.s32 3, %v3359_v41 }
  0xd7   :  { %2194 = vmatprep.subr.bf16.mxu0 %v2916_v48  ;;  %2255 = vmatprep.subr.bf16.mxu1 %v3044_v51  ;;  %v250_v48 = vsub.s32 0, %v3359_v41  ;;  %v258_v51 = vsub.s32 2, %v3359_v41 }
  0xd8   :  { %v3370_v55 = vrot.slane %v246_v52, %v254_v42 }
  0xda   :  { %2195 = vmatpush2.bf16.msra.mxu0 %v2915_v56  ;;  %2256 = vmatpush2.bf16.msra.mxu1 %v3043_v44  ;;  %v3374_v56 = vrot.slane %v246_v52, %v262_v43  ;;  %v3378_v44 = vrot.slane %v246_v52, %v250_v48 }
  0xdb   :  { %2196 = vmatprep.subr.bf16.mxu0 %v2908_v45  ;;  %2257 = vmatprep.subr.bf16.mxu1 %v3036_v46  ;;  %v3382_v45 = vrot.slane %v246_v52, %v258_v51 }
  0xde   :  { %2197 = vmatpush2.bf16.msra.mxu0 %v2907_v58  ;;  %2258 = vmatpush2.bf16.msra.mxu1 %v3035_v59 }
  0xdf   :  { %2198 = vmatprep.subr.bf16.mxu0 %v2900_v60  ;;  %2259 = vmatprep.subr.bf16.mxu1 %v3028_v61 }
  0xe2   :  { %2199 = vmatpush2.bf16.msra.mxu0 %v2899_v3  ;;  %2260 = vmatpush2.bf16.msra.mxu1 %v3027_v4 }
  0xe3   :  { %2200 = vmatprep.subr.bf16.mxu0 %v2892_v5  ;;  %2261 = vmatprep.subr.bf16.mxu1 %v3020_v6  ;;  %v647_v6 = vld [vmem:[#allocation6 + $0x188] sm:$0xff] }
  0xe6   :  { %2201 = vmatpush2.bf16.msra.mxu0 %v2891_v7  ;;  %2262 = vmatpush2.bf16.msra.mxu1 %v3019_v8  ;;  %v651_v7 = vld [vmem:[#allocation6 + $0x1a8] sm:$0xff] }
  0xe7   :  { %2202 = vmatprep.subr.bf16.mxu0 %v2884_v12  ;;  %2263 = vmatprep.subr.bf16.mxu1 %v3012_v16  ;;  %v775_v12 = vld [vmem:[#allocation6 + $0x588] sm:$0xff]  ;;  %v2853_v28 = vcombine.low %v647_v6, %v651_v7 }
  0xe8   :  { %v2982_v1 = vcombine.high %v775_v12, %v779_v13  ;;  %v2981_v34 = vcombine.low %v775_v12, %v779_v13  ;;  %v627_v13 = vld [vmem:[#allocation6 + $0xe8] sm:$0xff] }
  0xea   :  { %2203 = vmatpush2.bf16.msra.mxu0 %v2883_v14  ;;  %2264 = vmatpush2.bf16.msra.mxu1 %v3011_v15 }
  0xeb   :  { %2204 = vmatprep.subr.bf16.mxu0 %v2876_v20  ;;  %2265 = vmatprep.subr.bf16.mxu1 %v3004_v23  ;;  %v2854_v20 = vcombine.high %v647_v6, %v651_v7 }
  0xee   :  { %2205 = vmatpush2.bf16.msra.mxu0 %v2875_v21  ;;  %2266 = vmatpush2.bf16.msra.mxu1 %v3003_v22  ;;  %v639_v21 = vld [vmem:[#allocation6 + $0x148] sm:$0xff] }
  0xef   :  { %2206 = vmatprep.subr.bf16.mxu0 %v2868_v27  ;;  %2267 = vmatprep.subr.bf16.mxu1 %v2996_v31  ;;  %v643_v22 = vld [vmem:[#allocation6 + $0x168] sm:$0xff] }
  0xf2   :  { %2207 = vmatpush2.bf16.msra.mxu0 %v2867_v29  ;;  %2268 = vmatpush2.bf16.msra.mxu1 %v2995_v30 }
  0xf3   :  { %2298 = vmatprep.subr.bf16.mxu0 %v2862_v35  ;;  %2359 = vmatprep.subr.bf16.mxu1 %v2990_v39  ;;  %v2846_v35 = vcombine.high %v639_v21, %v643_v22  ;;  %v3411_v39 = vld [vmem:[#allocation6 + $0x128] sm:$0xff] }
  0xf4   :  { %v2837_v7 = vcombine.low %v3409_v36, %v3411_v39 }
 0x173   :  { %v478_v53 = vpop.f32.mrf.mxu0  ;;  %v539_v54 = vpop.f32.mrf.mxu1 }
 0x174   :  { %v479_v61 = vadd.f32 %v478_v53, %v3378_v44  ;;  %v540_v62 = vadd.f32 %v539_v54, %v3382_v45  ;;  %v2974_v53 = vcombine.high %v767_v25, %v771_v26  ;;  %v759_v54 = vld [vmem:[#allocation6 + $0x508] sm:$0xff] }
 0x175   :  { %v480_v46 = vpop.f32.mrf.mxu0  ;;  %v541_v47 = vpop.f32.mrf.mxu1 }
 0x176   :  { %v481_v57 = vadd.f32 %v480_v46, %v3370_v55  ;;  %v542_v58 = vadd.f32 %v541_v47, %v3374_v56  ;;  %v566_v14 = vmax.f32 %v479_v61, 0.0  ;;  %v568_v15 = vmax.f32 %v540_v62, 0.0  ;;  %v763_v46 = vld [vmem:[#allocation6 + $0x528] sm:$0xff] }
 0x177   :  { %v482_v49 = vpop.f32.mrf.mxu0  ;;  %v543_v50 = vpop.f32.mrf.mxu1  ;;  %v2965_v12 = vcombine.low %v759_v54, %v763_v46 }
 0x178   :  { %v483_v59 = vadd.f32 %v482_v49, %v3378_v44  ;;  %v544_v60 = vadd.f32 %v543_v50, %v3382_v45  ;;  %v567_v8 = vmax.f32 %v481_v57, 0.0  ;;  %v569_v9 = vmax.f32 %v542_v58, 0.0 }
 0x179   :  { %v484_v63 = vpop.f32.mrf.mxu0  ;;  %v545_v0 = vpop.f32.mrf.mxu1  ;;  %v2838_v57 = vcombine.high %v3409_v36, %v3411_v39 }
 0x17a   :  { %v485_v2 = vadd.f32 %v484_v63, %v3370_v55  ;;  %v546_v3 = vadd.f32 %v545_v0, %v3374_v56  ;;  %v570_v4 = vmax.f32 %v483_v59, 0.0  ;;  %v572_v5 = vmax.f32 %v544_v60, 0.0 }
 0x17b   :  { %v2966_v63 = vcombine.high %v759_v54, %v763_v46 }
 0x17c   :  { %v571_v10 = vmax.f32 %v485_v2, 0.0  ;;  %v573_v11 = vmax.f32 %v546_v3, 0.0  ;;  %v3396_v18 = vpack.c.bf16 %v570_v4, %v566_v14  ;;  %v3398_v19 = vpack.c.bf16 %v572_v5, %v568_v15  ;;  %v751_v14 = vld [vmem:[#allocation6 + $0x4c8] sm:$0xff] }
 0x17d   :  { %v755_v15 = vld [vmem:[#allocation6 + $0x4e8] sm:$0xff] }
 0x17e   :  { %v3392_v16 = vpack.c.bf16 %v571_v10, %v567_v8  ;;  %v3394_v17 = vpack.c.bf16 %v573_v11, %v569_v9  ;;  %v623_v8 = vld [vmem:[#allocation6 + $0xc8] sm:$0xff] }
 0x180   :  { %v488_v23 = vpop.f32.mrf.mxu0  ;;  %v549_v24 = vpop.f32.mrf.mxu1  ;;  %2208 = vmatprep.mubr.bf16.mxu0 %v3392_v16  ;;  %2269 = vmatprep.mubr.bf16.mxu1 %v3394_v17 }
 0x181   :  { %v489_v27 = vadd.f32 %v488_v23, %v3378_v44  ;;  %2209 = vmatmul.mubr.bf16.vlgmr.msra.gmra.mxu0 %v3396_v18  ;;  %2270 = vmatmul.mubr.bf16.vlgmr.msra.gmra.mxu1 %v3398_v19  ;;  %v550_v29 = vadd.f32 %v549_v24, %v3382_v45 }
 0x182   :  { %2299 = vmatpush1.bf16.msra.mxu0 %v2861_v37  ;;  %2360 = vmatpush1.bf16.msra.mxu1 %v2989_v38  ;;  %v490_v30 = vpop.f32.mrf.mxu0  ;;  %v551_v31 = vpop.f32.mrf.mxu1  ;;  %v2845_v37 = vcombine.low %v639_v21, %v643_v22  ;;  %v2973_v38 = vcombine.low %v767_v25, %v771_v26 }
 0x183   :  { %v491_v40 = vadd.f32 %v490_v30, %v3370_v55  ;;  %v552_v52 = vadd.f32 %v551_v31, %v3374_v56  ;;  %2300 = vmatprep.subr.bf16.mxu0 %v2854_v20  ;;  %2361 = vmatprep.subr.bf16.mxu1 %v2982_v1  ;;  %v574_v47 = vmax.f32 %v489_v27, 0.0  ;;  %v576_v58 = vmax.f32 %v550_v29, 0.0  ;;  %v615_v27 = vld [vmem:[#allocation6 + $0x88] sm:$0xff] }
 0x184   :  { %v492_v32 = vpop.f32.mrf.mxu0  ;;  %v553_v33 = vpop.f32.mrf.mxu1  ;;  %v2830_v30 = vcombine.high %v623_v8, %v627_v13  ;;  %v2958_v31 = vcombine.high %v751_v14, %v755_v15 }
 0x185   :  { %v493_v49 = vadd.f32 %v492_v32, %v3378_v44  ;;  %v554_v50 = vadd.f32 %v553_v33, %v3382_v45  ;;  %v575_v59 = vmax.f32 %v491_v40, 0.0  ;;  %v577_v60 = vmax.f32 %v552_v52, 0.0 }
 0x186   :  { %2301 = vmatpush1.bf16.msra.mxu0 %v2853_v28  ;;  %2362 = vmatpush1.bf16.msra.mxu1 %v2981_v34  ;;  %v494_v61 = vpop.f32.mrf.mxu0  ;;  %v555_v62 = vpop.f32.mrf.mxu1  ;;  %v619_v28 = vld [vmem:[#allocation6 + $0xa8] sm:$0xff]  ;;  %v2829_v40 = vcombine.low %v623_v8, %v627_v13 }
 0x187   :  { %v578_v0 = vmax.f32 %v493_v49, 0.0  ;;  %v580_v2 = vmax.f32 %v554_v50, 0.0  ;;  %v495_v3 = vadd.f32 %v494_v61, %v3370_v55  ;;  %v556_v4 = vadd.f32 %v555_v62, %v3374_v56  ;;  %2302 = vmatprep.subr.bf16.mxu0 %v2846_v35  ;;  %2363 = vmatprep.subr.bf16.mxu1 %v2974_v53  ;;  %v743_v34 = vld [vmem:[#allocation6 + $0x488] sm:$0xff] }
 0x188   :  { %v498_v5 = vpop.f32.mrf.mxu0  ;;  %v559_v6 = vpop.f32.mrf.mxu1  ;;  %v2822_v52 = vcombine.high %v615_v27, %v619_v28  ;;  %v611_v50 = vld [vmem:[#allocation6 + $0x68] sm:$0xff] }
 0x189   :  { %v3423_v9 = vpack.c.bf16 %v578_v0, %v574_v47  ;;  %v579_v10 = vmax.f32 %v495_v3, 0.0  ;;  %v581_v11 = vmax.f32 %v556_v4, 0.0  ;;  %v3425_v20 = vpack.c.bf16 %v580_v2, %v576_v58  ;;  %v739_v58 = vld [vmem:[#allocation6 + $0x468] sm:$0xff] }
 0x18a   :  { %2303 = vmatpush1.bf16.msra.mxu0 %v2845_v37  ;;  %2364 = vmatpush1.bf16.msra.mxu1 %v2973_v38  ;;  %v499_v1 = vadd.f32 %v498_v5, %v3378_v44  ;;  %v560_v21 = vadd.f32 %v559_v6, %v3382_v45  ;;  %v500_v22 = vpop.f32.mrf.mxu0  ;;  %v561_v23 = vpop.f32.mrf.mxu1  ;;  %v747_v44 = vld [vmem:[#allocation6 + $0x4a8] sm:$0xff]  ;;  %v2821_v47 = vcombine.low %v615_v27, %v619_v28 }
 0x18b   :  { %v3429_v24 = vpack.c.bf16 %v579_v10, %v575_v59  ;;  %v3431_v25 = vpack.c.bf16 %v581_v11, %v577_v60  ;;  %2304 = vmatprep.subr.bf16.mxu0 %v2838_v57  ;;  %2365 = vmatprep.subr.bf16.mxu1 %v2966_v63  ;;  %v501_v26 = vadd.f32 %v500_v22, %v3370_v55  ;;  %v607_v38 = vld [vmem:[#allocation6 + $0x48] sm:$0xff] }
 0x18c   :  { %v562_v29 = vadd.f32 %v561_v23, %v3374_v56  ;;  %v502_v35 = vpop.f32.mrf.mxu0  ;;  %v563_v45 = vpop.f32.mrf.mxu1  ;;  %v2957_v55 = vcombine.low %v751_v14, %v755_v15  ;;  %v582_v56 = vmax.f32 %v499_v1, 0.0  ;;  %v584_v46 = vmax.f32 %v560_v21, 0.0  ;;  %v735_v57 = vld [vmem:[#allocation6 + $0x448] sm:$0xff] }
 0x18d   :  { %2218 = vmatprep.mubr.bf16.mxu0 %v3429_v24  ;;  %2279 = vmatprep.mubr.bf16.mxu1 %v3431_v25  ;;  %v583_v36 = vmax.f32 %v501_v26, 0.0  ;;  %v2950_v33 = vcombine.high %v743_v34, %v747_v44  ;;  %v2949_v49 = vcombine.low %v743_v34, %v747_v44  ;;  %v599_v61 = vld [vmem:[#allocation6 + $0x8] sm:$0xff]  ;;  %v2814_v2 = vcombine.high %v607_v38, %v611_v50 }
 0x18e   :  { %2305 = vmatpush1.bf16.msra.mxu0 %v2837_v7  ;;  %2366 = vmatpush1.bf16.msra.mxu1 %v2965_v12  ;;  %v585_v39 = vmax.f32 %v562_v29, 0.0  ;;  %v503_v53 = vpop.f32.mrf.mxu0  ;;  %v564_v54 = vpop.f32.mrf.mxu1  ;;  %v3444_v59 = vpack.c.bf16 %v582_v56, %v582_v56  ;;  %v3446_v60 = vpack.c.bf16 %v584_v46, %v584_v46  ;;  %v603_v62 = vld [vmem:[#allocation6 + $0x28] sm:$0xff]  ;;  %v2942_v3 = vcombine.high %v735_v57, %v739_v58 }
 0x18f   :  { %v3437_v32 = vpack.c.bf16 %v583_v36, %v583_v36  ;;  %2219 = vmatmul.mubr.bf16.gmra.mxu0 %v3423_v9  ;;  %2280 = vmatmul.mubr.bf16.gmra.mxu1 %v3425_v20  ;;  %v727_v63 = vld [vmem:[#allocation6 + $0x408] sm:$0xff]  ;;  %v2813_v4 = vcombine.low %v607_v38, %v611_v50  ;;  %v2941_v5 = vcombine.low %v735_v57, %v739_v58 }
 0x190   :  { %v3441_v37 = vpack.c.bf16 %v585_v39, %v585_v39  ;;  %2306 = vmatprep.subr.bf16.mxu0 %v2830_v30  ;;  %2367 = vmatprep.subr.bf16.mxu1 %v2958_v31  ;;  %v731_v0 = vld [vmem:[#allocation6 + $0x428] sm:$0xff]  ;;  %v2806_v6 = vcombine.high %v599_v61, %v603_v62  ;;  %v2805_v13 = vcombine.low %v599_v61, %v603_v62 }
 0x191   :  { %2228 = vmatprep.mubr.bf16.mxu0 %v3437_v32  ;;  %v2934_v7 = vcombine.high %v727_v63, %v731_v0  ;;  %v719_v8 = vld [vmem:[#allocation6 + $0x3c8] sm:$0xff]  ;;  %v2933_v14 = vcombine.low %v727_v63, %v731_v0 }
 0x192   :  { %2307 = vmatpush1.bf16.msra.mxu0 %v2829_v40  ;;  %2368 = vmatpush1.bf16.msra.mxu1 %v2957_v55  ;;  %v723_v10 = vld [vmem:[#allocation6 + $0x3e8] sm:$0xff] }
 0x193   :  { %2308 = vmatprep.subr.bf16.mxu0 %v2822_v52  ;;  %2369 = vmatprep.subr.bf16.mxu1 %v2950_v33  ;;  %v847_v11 = vld [vmem:[#allocation6 + $0x7c8] sm:$0xff]  ;;  %v2926_v15 = vcombine.high %v719_v8, %v723_v10  ;;  %v2925_v27 = vcombine.low %v719_v8, %v723_v10 }
 0x194   :  { %2289 = vmatprep.mubr.bf16.mxu1 %v3441_v37  ;;  %v851_v12 = vld [vmem:[#allocation6 + $0x7e8] sm:$0xff] }
 0x195   :  { %v3054_v1 = vcombine.high %v847_v11, %v851_v12  ;;  %v711_v21 = vld [vmem:[#allocation6 + $0x388] sm:$0xff]  ;;  %v3053_v28 = vcombine.low %v847_v11, %v851_v12 }
 0x196   :  { %2309 = vmatpush1.bf16.msra.mxu0 %v2821_v47  ;;  %2370 = vmatpush1.bf16.msra.mxu1 %v2949_v49  ;;  %v715_v22 = vld [vmem:[#allocation6 + $0x3a8] sm:$0xff] }
 0x197   :  { %2229 = vmatmul.mubr.bf16.gmra.mxu0 %v3444_v59  ;;  %2290 = vmatmul.mubr.bf16.gmra.mxu1 %v3446_v60  ;;  %v839_v23 = vld [vmem:[#allocation6 + $0x788] sm:$0xff]  ;;  %v2918_v29 = vcombine.high %v711_v21, %v715_v22  ;;  %v2917_v45 = vcombine.low %v711_v21, %v715_v22 }
 0x198   :  { %2330 = vmatprep.mubr.bf16.mxu0 %v3392_v16  ;;  %2391 = vmatprep.mubr.bf16.mxu1 %v3394_v17  ;;  %v843_v26 = vld [vmem:[#allocation6 + $0x7a8] sm:$0xff] }
 0x199   :  { %2310 = vmatprep.subr.bf16.mxu0 %v2814_v2  ;;  %2371 = vmatprep.subr.bf16.mxu1 %v2942_v3  ;;  %v3046_v30 = vcombine.high %v839_v23, %v843_v26  ;;  %v703_v31 = vld [vmem:[#allocation6 + $0x348] sm:$0xff]  ;;  %v3045_v36 = vcombine.low %v839_v23, %v843_v26 }
 0x19a   :  { %2311 = vmatpush1.bf16.msra.mxu0 %v2813_v4  ;;  %2372 = vmatpush1.bf16.msra.mxu1 %v2941_v5  ;;  %v707_v34 = vld [vmem:[#allocation6 + $0x368] sm:$0xff] }
 0x19b   :  { %2312 = vmatprep.subr.bf16.mxu0 %v2806_v6  ;;  %2373 = vmatprep.subr.bf16.mxu1 %v2934_v7  ;;  %v831_v44 = vld [vmem:[#allocation6 + $0x748] sm:$0xff]  ;;  %v2910_v39 = vcombine.high %v703_v31, %v707_v34  ;;  %v2909_v56 = vcombine.low %v703_v31, %v707_v34  ;;  %v656_v34 = vld [vmem:[#allocation6 + $0x1d0] sm:$0xff] }
 0x19c   :  { %v835_v35 = vld [vmem:[#allocation6 + $0x768] sm:$0xff] }
 0x19d   :  { %v3038_v40 = vcombine.high %v831_v44, %v835_v35  ;;  %v695_v55 = vld [vmem:[#allocation6 + $0x308] sm:$0xff]  ;;  %v3037_v46 = vcombine.low %v831_v44, %v835_v35  ;;  %v660_v44 = vld [vmem:[#allocation6 + $0x1f0] sm:$0xff] }
 0x19e   :  { %2313 = vmatpush1.bf16.msra.mxu0 %v2805_v13  ;;  %2374 = vmatpush1.bf16.msra.mxu1 %v2933_v14  ;;  %v699_v52 = vld [vmem:[#allocation6 + $0x328] sm:$0xff]  ;;  %v784_v35 = vld [vmem:[#allocation6 + $0x5d0] sm:$0xff] }
 0x19f   :  { %2314 = vmatprep.subr.bf16.mxu0 %v2926_v15  ;;  %2375 = vmatprep.subr.bf16.mxu1 %v3054_v1  ;;  %v823_v53 = vld [vmem:[#allocation6 + $0x708] sm:$0xff]  ;;  %v2902_v33 = vcombine.high %v695_v55, %v699_v52  ;;  %v2901_v58 = vcombine.low %v695_v55, %v699_v52  ;;  %v648_v52 = vld [vmem:[#allocation6 + $0x190] sm:$0xff] }
 0x1a0   :  { %v827_v54 = vld [vmem:[#allocation6 + $0x728] sm:$0xff] }
 0x1a1   :  { %v3030_v38 = vcombine.high %v823_v53, %v827_v54  ;;  %v687_v47 = vld [vmem:[#allocation6 + $0x2c8] sm:$0xff]  ;;  %v3029_v61 = vcombine.low %v823_v53, %v827_v54  ;;  %v652_v53 = vld [vmem:[#allocation6 + $0x1b0] sm:$0xff] }
 0x1a2   :  { %2315 = vmatpush2.bf16.msra.mxu0 %v2925_v27  ;;  %2376 = vmatpush2.bf16.msra.mxu1 %v3053_v28  ;;  %v691_v49 = vld [vmem:[#allocation6 + $0x2e8] sm:$0xff]  ;;  %v776_v54 = vld [vmem:[#allocation6 + $0x590] sm:$0xff] }
 0x1a3   :  { %2316 = vmatprep.subr.bf16.mxu0 %v2918_v29  ;;  %2377 = vmatprep.subr.bf16.mxu1 %v3046_v30  ;;  %v815_v50 = vld [vmem:[#allocation6 + $0x6c8] sm:$0xff]  ;;  %v2894_v62 = vcombine.high %v687_v47, %v691_v49  ;;  %v2893_v5 = vcombine.low %v687_v47, %v691_v49  ;;  %v640_v49 = vld [vmem:[#allocation6 + $0x150] sm:$0xff] }
 0x1a4   :  { %v819_v57 = vld [vmem:[#allocation6 + $0x6e8] sm:$0xff] }
 0x1a5   :  { %v3022_v63 = vcombine.high %v815_v50, %v819_v57  ;;  %v679_v0 = vld [vmem:[#allocation6 + $0x288] sm:$0xff]  ;;  %v3021_v6 = vcombine.low %v815_v50, %v819_v57  ;;  %v644_v50 = vld [vmem:[#allocation6 + $0x170] sm:$0xff] }
 0x1a6   :  { %2317 = vmatpush2.bf16.msra.mxu0 %v2917_v45  ;;  %2378 = vmatpush2.bf16.msra.mxu1 %v3045_v36  ;;  %v683_v2 = vld [vmem:[#allocation6 + $0x2a8] sm:$0xff]  ;;  %v788_v45 = vld [vmem:[#allocation6 + $0x5f0] sm:$0xff] }
 0x1a7   :  { %2318 = vmatprep.subr.bf16.mxu0 %v2910_v39  ;;  %2379 = vmatprep.subr.bf16.mxu1 %v3038_v40  ;;  %v807_v3 = vld [vmem:[#allocation6 + $0x688] sm:$0xff]  ;;  %v2886_v7 = vcombine.high %v679_v0, %v683_v2  ;;  %v2885_v14 = vcombine.low %v679_v0, %v683_v2  ;;  %v2864_v40 = vcombine.high %v656_v34, %v660_v44  ;;  %v768_v57 = vld [vmem:[#allocation6 + $0x550] sm:$0xff] }
 0x1a8   :  { %v811_v4 = vld [vmem:[#allocation6 + $0x6a8] sm:$0xff]  ;;  %v2992_v55 = vcombine.high %v784_v35, %v788_v45  ;;  %v632_v2 = vld [vmem:[#allocation6 + $0x110] sm:$0xff] }
 0x1a9   :  { %v3014_v8 = vcombine.high %v807_v3, %v811_v4  ;;  %v671_v10 = vld [vmem:[#allocation6 + $0x248] sm:$0xff]  ;;  %v3013_v15 = vcombine.low %v807_v3, %v811_v4  ;;  %v636_v3 = vld [vmem:[#allocation6 + $0x130] sm:$0xff] }
 0x1aa   :  { %2319 = vmatpush2.bf16.msra.mxu0 %v2909_v56  ;;  %2380 = vmatpush2.bf16.msra.mxu1 %v3037_v46  ;;  %v675_v11 = vld [vmem:[#allocation6 + $0x268] sm:$0xff]  ;;  %v780_v56 = vld [vmem:[#allocation6 + $0x5b0] sm:$0xff]  ;;  %v2863_v46 = vcombine.low %v656_v34, %v660_v44 }
 0x1ab   :  { %2320 = vmatprep.subr.bf16.mxu0 %v2902_v33  ;;  %2381 = vmatprep.subr.bf16.mxu1 %v3030_v38  ;;  %v799_v12 = vld [vmem:[#allocation6 + $0x648] sm:$0xff]  ;;  %v2878_v1 = vcombine.high %v671_v10, %v675_v11  ;;  %v2877_v28 = vcombine.low %v671_v10, %v675_v11  ;;  %v2991_v33 = vcombine.low %v784_v35, %v788_v45  ;;  %v760_v4 = vld [vmem:[#allocation6 + $0x510] sm:$0xff] }
 0x1ac   :  { %v803_v13 = vld [vmem:[#allocation6 + $0x668] sm:$0xff]  ;;  %v2856_v38 = vcombine.high %v648_v52, %v652_v53  ;;  %v2984_v47 = vcombine.high %v776_v54, %v780_v56  ;;  %v624_v11 = vld [vmem:[#allocation6 + $0xd0] sm:$0xff] }
 0x1ad   :  { %v3006_v21 = vcombine.high %v799_v12, %v803_v13  ;;  %v663_v22 = vld [vmem:[#allocation6 + $0x208] sm:$0xff]  ;;  %v3005_v29 = vcombine.low %v799_v12, %v803_v13  ;;  %v628_v12 = vld [vmem:[#allocation6 + $0xf0] sm:$0xff] }
 0x1ae   :  { %2321 = vmatpush2.bf16.msra.mxu0 %v2901_v58  ;;  %2382 = vmatpush2.bf16.msra.mxu1 %v3029_v61  ;;  %v667_v23 = vld [vmem:[#allocation6 + $0x228] sm:$0xff]  ;;  %v772_v58 = vld [vmem:[#allocation6 + $0x570] sm:$0xff]  ;;  %v2855_v61 = vcombine.low %v648_v52, %v652_v53 }
 0x1af   :  { %2322 = vmatprep.subr.bf16.mxu0 %v2894_v62  ;;  %2383 = vmatprep.subr.bf16.mxu1 %v3022_v63  ;;  %v791_v26 = vld [vmem:[#allocation6 + $0x608] sm:$0xff]  ;;  %v2870_v30 = vcombine.high %v663_v22, %v667_v23  ;;  %v2869_v36 = vcombine.low %v663_v22, %v667_v23  ;;  %v2983_v62 = vcombine.low %v776_v54, %v780_v56  ;;  %v752_v13 = vld [vmem:[#allocation6 + $0x4d0] sm:$0xff] }
 0x1b0   :  { %v795_v27 = vld [vmem:[#allocation6 + $0x628] sm:$0xff]  ;;  %v2848_v63 = vcombine.high %v640_v49, %v644_v50  ;;  %v2976_v0 = vcombine.high %v768_v57, %v772_v58  ;;  %v616_v23 = vld [vmem:[#allocation6 + $0x90] sm:$0xff] }
 0x1b1   :  { %v2998_v31 = vcombine.high %v791_v26, %v795_v27  ;;  %v2997_v39 = vcombine.low %v791_v26, %v795_v27  ;;  %v620_v26 = vld [vmem:[#allocation6 + $0xb0] sm:$0xff] }
 0x1b2   :  { %2323 = vmatpush2.bf16.msra.mxu0 %v2893_v5  ;;  %2384 = vmatpush2.bf16.msra.mxu1 %v3021_v6  ;;  %v764_v5 = vld [vmem:[#allocation6 + $0x530] sm:$0xff]  ;;  %v2847_v6 = vcombine.low %v640_v49, %v644_v50 }
 0x1b3   :  { %2324 = vmatprep.subr.bf16.mxu0 %v2886_v7  ;;  %2385 = vmatprep.subr.bf16.mxu1 %v3014_v8  ;;  %v2975_v7 = vcombine.low %v768_v57, %v772_v58  ;;  %v2840_v8 = vcombine.high %v632_v2, %v636_v3  ;;  %v2968_v10 = vcombine.high %v760_v4, %v764_v5  ;;  %v744_v27 = vld [vmem:[#allocation6 + $0x490] sm:$0xff] }
 0x1b4   :  { %v608_v44 = vld [vmem:[#allocation6 + $0x50] sm:$0xff] }
 0x1b5   :  { %v612_v35 = vld [vmem:[#allocation6 + $0x70] sm:$0xff] }
 0x1b6   :  { %2325 = vmatpush2.bf16.msra.mxu0 %v2885_v14  ;;  %2386 = vmatpush2.bf16.msra.mxu1 %v3013_v15  ;;  %v756_v14 = vld [vmem:[#allocation6 + $0x4f0] sm:$0xff]  ;;  %v2839_v15 = vcombine.low %v632_v2, %v636_v3 }
 0x1b7   :  { %2326 = vmatprep.subr.bf16.mxu0 %v2878_v1  ;;  %2387 = vmatprep.subr.bf16.mxu1 %v3006_v21  ;;  %v2967_v1 = vcombine.low %v760_v4, %v764_v5  ;;  %v2832_v21 = vcombine.high %v624_v11, %v628_v12  ;;  %v2960_v22 = vcombine.high %v752_v13, %v756_v14  ;;  %v736_v45 = vld [vmem:[#allocation6 + $0x450] sm:$0xff] }
 0x1b8   :  { %v600_v53 = vld [vmem:[#allocation6 + $0x10] sm:$0xff] }
 0x1b9   :  { %v604_v54 = vld [vmem:[#allocation6 + $0x30] sm:$0xff] }
 0x1ba   :  { %2327 = vmatpush2.bf16.msra.mxu0 %v2877_v28  ;;  %2388 = vmatpush2.bf16.msra.mxu1 %v3005_v29  ;;  %v748_v28 = vld [vmem:[#allocation6 + $0x4b0] sm:$0xff]  ;;  %v2831_v29 = vcombine.low %v624_v11, %v628_v12 }
 0x1bb   :  { %2328 = vmatprep.subr.bf16.mxu0 %v2870_v30  ;;  %2389 = vmatprep.subr.bf16.mxu1 %v2998_v31  ;;  %v2959_v30 = vcombine.low %v752_v13, %v756_v14  ;;  %v2824_v31 = vcombine.high %v616_v23, %v620_v26  ;;  %v2952_v34 = vcombine.high %v744_v27, %v748_v28  ;;  %v728_v56 = vld [vmem:[#allocation6 + $0x410] sm:$0xff] }
 0x1bc   :  { %v720_v50 = vld [vmem:[#allocation6 + $0x3d0] sm:$0xff] }
 0x1bd   :  { %v724_v57 = vld [vmem:[#allocation6 + $0x3f0] sm:$0xff] }
 0x1be   :  { %2329 = vmatpush2.bf16.msra.mxu0 %v2869_v36  ;;  %2390 = vmatpush2.bf16.msra.mxu1 %v2997_v39  ;;  %v740_v36 = vld [vmem:[#allocation6 + $0x470] sm:$0xff]  ;;  %v2823_v39 = vcombine.low %v616_v23, %v620_v26 }
 0x1bf   :  { %2420 = vmatprep.subr.bf16.mxu0 %v2864_v40  ;;  %2481 = vmatprep.subr.bf16.mxu1 %v2992_v55  ;;  %v2951_v40 = vcombine.low %v744_v27, %v748_v28  ;;  %v2816_v55 = vcombine.high %v608_v44, %v612_v35  ;;  %v2944_v52 = vcombine.high %v736_v45, %v740_v36  ;;  %v848_v58 = vld [vmem:[#allocation6 + $0x7d0] sm:$0xff] }
 0x1c0   :  { %v712_v3 = vld [vmem:[#allocation6 + $0x390] sm:$0xff] }
 0x1c1   :  { %2331 = vmatmul.mubr.bf16.vlgmr.msra.gmra.mxu0 %v3396_v18  ;;  %2392 = vmatmul.mubr.bf16.vlgmr.msra.gmra.mxu1 %v3398_v19  ;;  %v716_v4 = vld [vmem:[#allocation6 + $0x3b0] sm:$0xff] }
 0x1c2   :  { %2340 = vmatprep.mubr.bf16.mxu0 %v3429_v24  ;;  %2401 = vmatprep.mubr.bf16.mxu1 %v3431_v25  ;;  %v840_v5 = vld [vmem:[#allocation6 + $0x790] sm:$0xff] }
 0x1c3   :  { %2421 = vmatpush1.bf16.msra.mxu0 %v2863_v46  ;;  %2482 = vmatpush1.bf16.msra.mxu1 %v2991_v33  ;;  %v732_v46 = vld [vmem:[#allocation6 + $0x430] sm:$0xff]  ;;  %v2815_v33 = vcombine.low %v608_v44, %v612_v35 }
 0x1c4   :  { %2422 = vmatprep.subr.bf16.mxu0 %v2856_v38  ;;  %2483 = vmatprep.subr.bf16.mxu1 %v2984_v47  ;;  %v2943_v38 = vcombine.low %v736_v45, %v740_v36  ;;  %v2808_v47 = vcombine.high %v600_v53, %v604_v54  ;;  %v2936_v49 = vcombine.high %v728_v56, %v732_v46  ;;  %v704_v12 = vld [vmem:[#allocation6 + $0x350] sm:$0xff] }
 0x1c5   :  { %v708_v13 = vld [vmem:[#allocation6 + $0x370] sm:$0xff] }
 0x1c6   :  { %v832_v14 = vld [vmem:[#allocation6 + $0x750] sm:$0xff] }
 0x1c7   :  { %2423 = vmatpush1.bf16.msra.mxu0 %v2855_v61  ;;  %2484 = vmatpush1.bf16.msra.mxu1 %v2983_v62  ;;  %v852_v61 = vld [vmem:[#allocation6 + $0x7f0] sm:$0xff]  ;;  %v2807_v62 = vcombine.low %v600_v53, %v604_v54 }
 0x1c8   :  { %2424 = vmatprep.subr.bf16.mxu0 %v2848_v63  ;;  %2485 = vmatprep.subr.bf16.mxu1 %v2976_v0  ;;  %v2935_v63 = vcombine.low %v728_v56, %v732_v46  ;;  %v2928_v0 = vcombine.high %v720_v50, %v724_v57  ;;  %v3056_v2 = vcombine.high %v848_v58, %v852_v61  ;;  %v696_v26 = vld [vmem:[#allocation6 + $0x310] sm:$0xff] }
 0x1c9   :  { %2341 = vmatmul.mubr.bf16.gmra.mxu0 %v3423_v9  ;;  %2402 = vmatmul.mubr.bf16.gmra.mxu1 %v3425_v20  ;;  %v700_v27 = vld [vmem:[#allocation6 + $0x330] sm:$0xff] }
 0x1ca   :  { %2350 = vmatprep.mubr.bf16.mxu0 %v3437_v32  ;;  %2411 = vmatprep.mubr.bf16.mxu1 %v3441_v37  ;;  %v824_v28 = vld [vmem:[#allocation6 + $0x710] sm:$0xff] }
 0x1cb   :  { %2425 = vmatpush1.bf16.msra.mxu0 %v2847_v6  ;;  %2486 = vmatpush1.bf16.msra.mxu1 %v2975_v7  ;;  %v844_v6 = vld [vmem:[#allocation6 + $0x7b0] sm:$0xff]  ;;  %v2927_v7 = vcombine.low %v720_v50, %v724_v57 }
 0x1cc   :  { %2426 = vmatprep.subr.bf16.mxu0 %v2840_v8  ;;  %2487 = vmatprep.subr.bf16.mxu1 %v2968_v10  ;;  %v3055_v8 = vcombine.low %v848_v58, %v852_v61  ;;  %v2920_v10 = vcombine.high %v712_v3, %v716_v4  ;;  %v3048_v11 = vcombine.high %v840_v5, %v844_v6  ;;  %v688_v35 = vld [vmem:[#allocation6 + $0x2d0] sm:$0xff] }
 0x1cd   :  { %v692_v45 = vld [vmem:[#allocation6 + $0x2f0] sm:$0xff] }
 0x1ce   :  { %v816_v36 = vld [vmem:[#allocation6 + $0x6d0] sm:$0xff] }
 0x1cf   :  { %2427 = vmatpush1.bf16.msra.mxu0 %v2839_v15  ;;  %2488 = vmatpush1.bf16.msra.mxu1 %v2967_v1  ;;  %v836_v15 = vld [vmem:[#allocation6 + $0x770] sm:$0xff]  ;;  %v2919_v1 = vcombine.low %v712_v3, %v716_v4 }
 0x1d0   :  { %2428 = vmatprep.subr.bf16.mxu0 %v2832_v21  ;;  %2489 = vmatprep.subr.bf16.mxu1 %v2960_v22  ;;  %v3047_v21 = vcombine.low %v840_v5, %v844_v6  ;;  %v2912_v22 = vcombine.high %v704_v12, %v708_v13  ;;  %v3040_v23 = vcombine.high %v832_v14, %v836_v15  ;;  %v680_v54 = vld [vmem:[#allocation6 + $0x290] sm:$0xff] }
 0x1d1   :  { %2351 = vmatmul.mubr.bf16.gmra.mxu0 %v3444_v59  ;;  %2412 = vmatmul.mubr.bf16.gmra.mxu1 %v3446_v60  ;;  %v684_v56 = vld [vmem:[#allocation6 + $0x2b0] sm:$0xff] }
 0x1d2   :  { %2452 = vmatprep.mubr.bf16.mxu0 %v3392_v16  ;;  %2513 = vmatprep.mubr.bf16.mxu1 %v3394_v17  ;;  %v808_v46 = vld [vmem:[#allocation6 + $0x690] sm:$0xff] }
 0x1d3   :  { %2429 = vmatpush1.bf16.msra.mxu0 %v2831_v29  ;;  %2490 = vmatpush1.bf16.msra.mxu1 %v2959_v30  ;;  %v828_v29 = vld [vmem:[#allocation6 + $0x730] sm:$0xff]  ;;  %v2911_v30 = vcombine.low %v704_v12, %v708_v13  ;;  %v657_v13 = vld [vmem:[#allocation6 + $0x1d8] sm:$0xff] }
 0x1d4   :  { %2430 = vmatprep.subr.bf16.mxu0 %v2824_v31  ;;  %2491 = vmatprep.subr.bf16.mxu1 %v2952_v34  ;;  %v3039_v31 = vcombine.low %v832_v14, %v836_v15  ;;  %v2904_v34 = vcombine.high %v696_v26, %v700_v27  ;;  %v3032_v44 = vcombine.high %v824_v28, %v828_v29  ;;  %v672_v57 = vld [vmem:[#allocation6 + $0x250] sm:$0xff]  ;;  %v661_v14 = vld [vmem:[#allocation6 + $0x1f8] sm:$0xff] }
 0x1d5   :  { %v676_v58 = vld [vmem:[#allocation6 + $0x270] sm:$0xff]  ;;  %v785_v15 = vld [vmem:[#allocation6 + $0x5d8] sm:$0xff] }
 0x1d6   :  { %v800_v61 = vld [vmem:[#allocation6 + $0x650] sm:$0xff] }
 0x1d7   :  { %2431 = vmatpush1.bf16.msra.mxu0 %v2823_v39  ;;  %2492 = vmatpush1.bf16.msra.mxu1 %v2951_v40  ;;  %v820_v39 = vld [vmem:[#allocation6 + $0x6f0] sm:$0xff]  ;;  %v2903_v40 = vcombine.low %v696_v26, %v700_v27  ;;  %v649_v27 = vld [vmem:[#allocation6 + $0x198] sm:$0xff] }
 0x1d8   :  { %2432 = vmatprep.subr.bf16.mxu0 %v2816_v55  ;;  %2493 = vmatprep.subr.bf16.mxu1 %v2944_v52  ;;  %v3031_v55 = vcombine.low %v824_v28, %v828_v29  ;;  %v2896_v52 = vcombine.high %v688_v35, %v692_v45  ;;  %v3024_v53 = vcombine.high %v816_v36, %v820_v39  ;;  %v664_v4 = vld [vmem:[#allocation6 + $0x210] sm:$0xff]  ;;  %v653_v28 = vld [vmem:[#allocation6 + $0x1b8] sm:$0xff] }
 0x1d9   :  { %v668_v5 = vld [vmem:[#allocation6 + $0x230] sm:$0xff]  ;;  %v777_v29 = vld [vmem:[#allocation6 + $0x598] sm:$0xff] }
 0x1da   :  { %v792_v6 = vld [vmem:[#allocation6 + $0x610] sm:$0xff] }
 0x1db   :  { %2433 = vmatpush1.bf16.msra.mxu0 %v2815_v33  ;;  %2494 = vmatpush1.bf16.msra.mxu1 %v2943_v38  ;;  %v812_v33 = vld [vmem:[#allocation6 + $0x6b0] sm:$0xff]  ;;  %v2895_v38 = vcombine.low %v688_v35, %v692_v45  ;;  %v641_v45 = vld [vmem:[#allocation6 + $0x158] sm:$0xff] }
 0x1dc   :  { %2434 = vmatprep.subr.bf16.mxu0 %v2808_v47  ;;  %2495 = vmatprep.subr.bf16.mxu1 %v2936_v49  ;;  %v3023_v47 = vcombine.low %v816_v36, %v820_v39  ;;  %v2888_v49 = vcombine.high %v680_v54, %v684_v56  ;;  %v3016_v50 = vcombine.high %v808_v46, %v812_v33  ;;  %v645_v36 = vld [vmem:[#allocation6 + $0x178] sm:$0xff] }
 0x1dd   :  { %v769_v39 = vld [vmem:[#allocation6 + $0x558] sm:$0xff] }
 0x1df   :  { %2435 = vmatpush1.bf16.msra.mxu0 %v2807_v62  ;;  %2496 = vmatpush1.bf16.msra.mxu1 %v2935_v63  ;;  %v804_v62 = vld [vmem:[#allocation6 + $0x670] sm:$0xff]  ;;  %v2887_v63 = vcombine.low %v680_v54, %v684_v56  ;;  %v633_v56 = vld [vmem:[#allocation6 + $0x118] sm:$0xff] }
 0x1e0   :  { %2436 = vmatprep.subr.bf16.mxu0 %v2928_v0  ;;  %2497 = vmatprep.subr.bf16.mxu1 %v3056_v2  ;;  %v3015_v0 = vcombine.low %v808_v46, %v812_v33  ;;  %v2880_v2 = vcombine.high %v672_v57, %v676_v58  ;;  %v3008_v3 = vcombine.high %v800_v61, %v804_v62  ;;  %v637_v46 = vld [vmem:[#allocation6 + $0x138] sm:$0xff] }
 0x1e1   :  { %v761_v33 = vld [vmem:[#allocation6 + $0x518] sm:$0xff] }
 0x1e3   :  { %2437 = vmatpush2.bf16.msra.mxu0 %v2927_v7  ;;  %2498 = vmatpush2.bf16.msra.mxu1 %v3055_v8  ;;  %v796_v7 = vld [vmem:[#allocation6 + $0x630] sm:$0xff]  ;;  %v2879_v8 = vcombine.low %v672_v57, %v676_v58  ;;  %v625_v58 = vld [vmem:[#allocation6 + $0xd8] sm:$0xff] }
 0x1e4   :  { %2438 = vmatprep.subr.bf16.mxu0 %v2920_v10  ;;  %2499 = vmatprep.subr.bf16.mxu1 %v3048_v11  ;;  %v3007_v10 = vcombine.low %v800_v61, %v804_v62  ;;  %v2872_v11 = vcombine.high %v664_v4, %v668_v5  ;;  %v3000_v12 = vcombine.high %v792_v6, %v796_v7  ;;  %v629_v61 = vld [vmem:[#allocation6 + $0xf8] sm:$0xff] }
 0x1e5   :  { %v753_v62 = vld [vmem:[#allocation6 + $0x4d8] sm:$0xff] }
 0x1e7   :  { %2439 = vmatpush2.bf16.msra.mxu0 %v2919_v1  ;;  %2500 = vmatpush2.bf16.msra.mxu1 %v3047_v21  ;;  %v789_v1 = vld [vmem:[#allocation6 + $0x5f8] sm:$0xff]  ;;  %v2871_v21 = vcombine.low %v664_v4, %v668_v5 }
 0x1e8   :  { %2440 = vmatprep.subr.bf16.mxu0 %v2912_v22  ;;  %2501 = vmatprep.subr.bf16.mxu1 %v3040_v23  ;;  %v2999_v22 = vcombine.low %v792_v6, %v796_v7  ;;  %v2866_v23 = vcombine.high %v657_v13, %v661_v14  ;;  %v2994_v26 = vcombine.high %v785_v15, %v789_v1  ;;  %v617_v5 = vld [vmem:[#allocation6 + $0x98] sm:$0xff] }
 0x1e9   :  { %v621_v6 = vld [vmem:[#allocation6 + $0xb8] sm:$0xff] }
 0x1ea   :  { %v745_v7 = vld [vmem:[#allocation6 + $0x498] sm:$0xff] }
 0x1eb   :  { %2441 = vmatpush2.bf16.msra.mxu0 %v2911_v30  ;;  %2502 = vmatpush2.bf16.msra.mxu1 %v3039_v31  ;;  %v781_v30 = vld [vmem:[#allocation6 + $0x5b8] sm:$0xff]  ;;  %v2865_v31 = vcombine.low %v657_v13, %v661_v14 }
 0x1ec   :  { %2442 = vmatprep.subr.bf16.mxu0 %v2904_v34  ;;  %2503 = vmatprep.subr.bf16.mxu1 %v3032_v44  ;;  %v2993_v34 = vcombine.low %v785_v15, %v789_v1  ;;  %v2858_v44 = vcombine.high %v649_v27, %v653_v28  ;;  %v2986_v35 = vcombine.high %v777_v29, %v781_v30  ;;  %v609_v14 = vld [vmem:[#allocation6 + $0x58] sm:$0xff] }
 0x1ed   :  { %v613_v15 = vld [vmem:[#allocation6 + $0x78] sm:$0xff] }
 0x1ee   :  { %v737_v1 = vld [vmem:[#allocation6 + $0x458] sm:$0xff] }
 0x1ef   :  { %2443 = vmatpush2.bf16.msra.mxu0 %v2903_v40  ;;  %2504 = vmatpush2.bf16.msra.mxu1 %v3031_v55  ;;  %v773_v40 = vld [vmem:[#allocation6 + $0x578] sm:$0xff]  ;;  %v2857_v55 = vcombine.low %v649_v27, %v653_v28 }
 0x1f0   :  { %2444 = vmatprep.subr.bf16.mxu0 %v2896_v52  ;;  %2505 = vmatprep.subr.bf16.mxu1 %v3024_v53  ;;  %v2985_v52 = vcombine.low %v777_v29, %v781_v30  ;;  %v2850_v53 = vcombine.high %v641_v45, %v645_v36  ;;  %v2978_v54 = vcombine.high %v769_v39, %v773_v40  ;;  %v601_v28 = vld [vmem:[#allocation6 + $0x18] sm:$0xff] }
 0x1f1   :  { %v605_v29 = vld [vmem:[#allocation6 + $0x38] sm:$0xff] }
 0x1f2   :  { %v729_v30 = vld [vmem:[#allocation6 + $0x418] sm:$0xff] }
 0x1f3   :  { %2445 = vmatpush2.bf16.msra.mxu0 %v2895_v38  ;;  %2506 = vmatpush2.bf16.msra.mxu1 %v3023_v47  ;;  %v765_v38 = vld [vmem:[#allocation6 + $0x538] sm:$0xff]  ;;  %v2849_v47 = vcombine.low %v641_v45, %v645_v36 }
 0x1f4   :  { %2446 = vmatprep.subr.bf16.mxu0 %v2888_v49  ;;  %2507 = vmatprep.subr.bf16.mxu1 %v3016_v50  ;;  %v2977_v49 = vcombine.low %v769_v39, %v773_v40  ;;  %v2842_v50 = vcombine.high %v633_v56, %v637_v46  ;;  %v2970_v57 = vcombine.high %v761_v33, %v765_v38  ;;  %v725_v45 = vld [vmem:[#allocation6 + $0x3f8] sm:$0xff] }
 0x1f5   :  { %v849_v36 = vld [vmem:[#allocation6 + $0x7d8] sm:$0xff]  ;;  %v2809_v40 = vcombine.low %v601_v28, %v605_v29 }
 0x1f6   :  { %v853_v39 = vld [vmem:[#allocation6 + $0x7f8] sm:$0xff] }
 0x1f7   :  { %2447 = vmatpush2.bf16.msra.mxu0 %v2887_v63  ;;  %2508 = vmatpush2.bf16.msra.mxu1 %v3015_v0  ;;  %v757_v63 = vld [vmem:[#allocation6 + $0x4f8] sm:$0xff]  ;;  %v2841_v0 = vcombine.low %v633_v56, %v637_v46 }
 0x1f8   :  { %2448 = vmatprep.subr.bf16.mxu0 %v2880_v2  ;;  %2509 = vmatprep.subr.bf16.mxu1 %v3008_v3  ;;  %v2969_v2 = vcombine.low %v761_v33, %v765_v38  ;;  %v2834_v3 = vcombine.high %v625_v58, %v629_v61  ;;  %v2962_v4 = vcombine.high %v753_v62, %v757_v63  ;;  %v717_v56 = vld [vmem:[#allocation6 + $0x3b8] sm:$0xff] }
 0x1f9   :  { %v841_v46 = vld [vmem:[#allocation6 + $0x798] sm:$0xff] }
 0x1fa   :  { %v845_v33 = vld [vmem:[#allocation6 + $0x7b8] sm:$0xff] }
 0x1fb   :  { %2449 = vmatpush2.bf16.msra.mxu0 %v2879_v8  ;;  %2510 = vmatpush2.bf16.msra.mxu1 %v3007_v10  ;;  %v749_v8 = vld [vmem:[#allocation6 + $0x4b8] sm:$0xff]  ;;  %v2833_v10 = vcombine.low %v625_v58, %v629_v61 }
 0x1fc   :  { %2450 = vmatprep.subr.bf16.mxu0 %v2872_v11  ;;  %2511 = vmatprep.subr.bf16.mxu1 %v3000_v12  ;;  %v2961_v11 = vcombine.low %v753_v62, %v757_v63  ;;  %v2826_v12 = vcombine.high %v617_v5, %v621_v6  ;;  %v2954_v13 = vcombine.high %v745_v7, %v749_v8  ;;  %v709_v58 = vld [vmem:[#allocation6 + $0x378] sm:$0xff] }
 0x1fd   :  { %v833_v61 = vld [vmem:[#allocation6 + $0x758] sm:$0xff] }
 0x1fe   :  { %v837_v62 = vld [vmem:[#allocation6 + $0x778] sm:$0xff] }
 0x1ff   :  { %2451 = vmatpush2.bf16.msra.mxu0 %v2871_v21  ;;  %2512 = vmatpush2.bf16.msra.mxu1 %v2999_v22  ;;  %v741_v21 = vld [vmem:[#allocation6 + $0x478] sm:$0xff]  ;;  %v2825_v22 = vcombine.low %v617_v5, %v621_v6 }
 0x200   :  { %2542 = vmatprep.subr.bf16.mxu0 %v2866_v23  ;;  %2603 = vmatprep.subr.bf16.mxu1 %v2994_v26  ;;  %v2953_v23 = vcombine.low %v745_v7, %v749_v8  ;;  %v2818_v26 = vcombine.high %v609_v14, %v613_v15  ;;  %v2946_v27 = vcombine.high %v737_v1, %v741_v21  ;;  %v701_v5 = vld [vmem:[#allocation6 + $0x338] sm:$0xff] }
 0x201   :  { %v825_v6 = vld [vmem:[#allocation6 + $0x718] sm:$0xff] }
 0x202   :  { %2453 = vmatmul.mubr.bf16.vlgmr.msra.gmra.mxu0 %v3396_v18  ;;  %2514 = vmatmul.mubr.bf16.vlgmr.msra.gmra.mxu1 %v3398_v19  ;;  %v829_v7 = vld [vmem:[#allocation6 + $0x738] sm:$0xff] }
 0x203   :  { %2462 = vmatprep.mubr.bf16.mxu0 %v3429_v24  ;;  %2523 = vmatprep.mubr.bf16.mxu1 %v3431_v25 }
 0x204   :  { %2543 = vmatpush1.bf16.msra.mxu0 %v2865_v31  ;;  %2604 = vmatpush1.bf16.msra.mxu1 %v2993_v34  ;;  %v733_v31 = vld [vmem:[#allocation6 + $0x438] sm:$0xff]  ;;  %v2817_v34 = vcombine.low %v609_v14, %v613_v15 }
 0x205   :  { %2544 = vmatprep.subr.bf16.mxu0 %v2858_v44  ;;  %2605 = vmatprep.subr.bf16.mxu1 %v2986_v35  ;;  %v2945_v44 = vcombine.low %v737_v1, %v741_v21  ;;  %v721_v35 = vld [vmem:[#allocation6 + $0x3d8] sm:$0xff] }
 0x206   :  { %v2929_v38 = vcombine.low %v721_v35, %v725_v45  ;;  %v693_v14 = vld [vmem:[#allocation6 + $0x2f8] sm:$0xff] }
 0x207   :  { %v817_v15 = vld [vmem:[#allocation6 + $0x6d8] sm:$0xff] }
 0x208   :  { %2545 = vmatpush1.bf16.msra.mxu0 %v2857_v55  ;;  %2606 = vmatpush1.bf16.msra.mxu1 %v2985_v52  ;;  %v2937_v55 = vcombine.low %v729_v30, %v733_v31  ;;  %v2930_v52 = vcombine.high %v721_v35, %v725_v45  ;;  %v821_v1 = vld [vmem:[#allocation6 + $0x6f8] sm:$0xff] }
 0x209   :  { %2546 = vmatprep.subr.bf16.mxu0 %v2850_v53  ;;  %2607 = vmatprep.subr.bf16.mxu1 %v2978_v54  ;;  %v3058_v53 = vcombine.high %v849_v36, %v853_v39  ;;  %v713_v54 = vld [vmem:[#allocation6 + $0x398] sm:$0xff] }
 0x20a   :  { %2463 = vmatmul.mubr.bf16.gmra.mxu0 %v3423_v9  ;;  %2524 = vmatmul.mubr.bf16.gmra.mxu1 %v3425_v20  ;;  %v2921_v63 = vcombine.low %v713_v54, %v717_v56  ;;  %v677_v35 = vld [vmem:[#allocation6 + $0x278] sm:$0xff] }
 0x20b   :  { %2472 = vmatprep.mubr.bf16.mxu0 %v3437_v32  ;;  %2533 = vmatprep.mubr.bf16.mxu1 %v3441_v37  ;;  %v801_v45 = vld [vmem:[#allocation6 + $0x658] sm:$0xff] }
 0x20c   :  { %2547 = vmatpush1.bf16.msra.mxu0 %v2849_v47  ;;  %2608 = vmatpush1.bf16.msra.mxu1 %v2977_v49  ;;  %v3057_v47 = vcombine.low %v849_v36, %v853_v39  ;;  %v2922_v49 = vcombine.high %v713_v54, %v717_v56  ;;  %v805_v36 = vld [vmem:[#allocation6 + $0x678] sm:$0xff] }
 0x20d   :  { %2548 = vmatprep.subr.bf16.mxu0 %v2842_v50  ;;  %2609 = vmatprep.subr.bf16.mxu1 %v2970_v57  ;;  %v3050_v50 = vcombine.high %v841_v46, %v845_v33  ;;  %v705_v57 = vld [vmem:[#allocation6 + $0x358] sm:$0xff] }
 0x20e   :  { %v2913_v8 = vcombine.low %v705_v57, %v709_v58  ;;  %v669_v54 = vld [vmem:[#allocation6 + $0x238] sm:$0xff] }
 0x20f   :  { %v793_v56 = vld [vmem:[#allocation6 + $0x618] sm:$0xff] }
 0x210   :  { %2549 = vmatpush1.bf16.msra.mxu0 %v2841_v0  ;;  %2610 = vmatpush1.bf16.msra.mxu1 %v2969_v2  ;;  %v3049_v0 = vcombine.low %v841_v46, %v845_v33  ;;  %v2914_v2 = vcombine.high %v705_v57, %v709_v58  ;;  %v797_v46 = vld [vmem:[#allocation6 + $0x638] sm:$0xff] }
 0x211   :  { %2550 = vmatprep.subr.bf16.mxu0 %v2834_v3  ;;  %2611 = vmatprep.subr.bf16.mxu1 %v2962_v4  ;;  %v3042_v3 = vcombine.high %v833_v61, %v837_v62  ;;  %v697_v4 = vld [vmem:[#allocation6 + $0x318] sm:$0xff]  ;;  %v3001_v57 = vcombine.low %v793_v56, %v797_v46 }
 0x212   :  { %2473 = vmatmul.mubr.bf16.gmra.mxu0 %v3444_v59  ;;  %2534 = vmatmul.mubr.bf16.gmra.mxu1 %v3446_v60  ;;  %v2905_v21 = vcombine.low %v697_v4, %v701_v5 }
 0x213   :  { %2574 = vmatprep.mubr.bf16.mxu0 %v3392_v16  ;;  %2635 = vmatprep.mubr.bf16.mxu1 %v3394_v17  ;;  %v2810_v16 = vcombine.high %v601_v28, %v605_v29  ;;  %v2938_v17 = vcombine.high %v729_v30, %v733_v31  ;;  %v685_v28 = vld [vmem:[#allocation6 + $0x2b8] sm:$0xff] }
 0x214   :  { %2551 = vmatpush1.bf16.msra.mxu0 %v2833_v10  ;;  %2612 = vmatpush1.bf16.msra.mxu1 %v2961_v11  ;;  %v3041_v10 = vcombine.low %v833_v61, %v837_v62  ;;  %v2906_v11 = vcombine.high %v697_v4, %v701_v5  ;;  %v809_v29 = vld [vmem:[#allocation6 + $0x698] sm:$0xff] }
 0x215   :  { %2552 = vmatprep.subr.bf16.mxu0 %v2826_v12  ;;  %2613 = vmatprep.subr.bf16.mxu1 %v2954_v13  ;;  %v3034_v12 = vcombine.high %v825_v6, %v829_v7  ;;  %v689_v13 = vld [vmem:[#allocation6 + $0x2d8] sm:$0xff] }
 0x216   :  { %v813_v30 = vld [vmem:[#allocation6 + $0x6b8] sm:$0xff]  ;;  %v2897_v31 = vcombine.low %v689_v13, %v693_v14 }
 0x218   :  { %2553 = vmatpush1.bf16.msra.mxu0 %v2825_v22  ;;  %2614 = vmatpush1.bf16.msra.mxu1 %v2953_v23  ;;  %v3033_v22 = vcombine.low %v825_v6, %v829_v7  ;;  %v2898_v23 = vcombine.high %v689_v13, %v693_v14 }
 0x219   :  { %2554 = vmatprep.subr.bf16.mxu0 %v2818_v26  ;;  %2615 = vmatprep.subr.bf16.mxu1 %v2946_v27  ;;  %v3026_v26 = vcombine.high %v817_v15, %v821_v1  ;;  %v681_v27 = vld [vmem:[#allocation6 + $0x298] sm:$0xff] }
 0x21a   :  { %v2889_v39 = vcombine.low %v681_v27, %v685_v28 }
 0x21c   :  { %2555 = vmatpush1.bf16.msra.mxu0 %v2817_v34  ;;  %2616 = vmatpush1.bf16.msra.mxu1 %v2945_v44  ;;  %v3025_v34 = vcombine.low %v817_v15, %v821_v1  ;;  %v2890_v44 = vcombine.high %v681_v27, %v685_v28 }
 0x21d   :  { %2556 = vmatprep.subr.bf16.mxu0 %v2810_v16  ;;  %2617 = vmatprep.subr.bf16.mxu1 %v2938_v17  ;;  %v3018_v16 = vcombine.high %v809_v29, %v813_v30  ;;  %v673_v17 = vld [vmem:[#allocation6 + $0x258] sm:$0xff] }
 0x21e   :  { %v2881_v33 = vcombine.low %v673_v17, %v677_v35 }
 0x220   :  { %2557 = vmatpush1.bf16.msra.mxu0 %v2809_v40  ;;  %2618 = vmatpush1.bf16.msra.mxu1 %v2937_v55  ;;  %v3017_v40 = vcombine.low %v809_v29, %v813_v30  ;;  %v2882_v55 = vcombine.high %v673_v17, %v677_v35 }
 0x221   :  { %2558 = vmatprep.subr.bf16.mxu0 %v2930_v52  ;;  %2619 = vmatprep.subr.bf16.mxu1 %v3058_v53  ;;  %v3010_v52 = vcombine.high %v801_v45, %v805_v36  ;;  %v665_v53 = vld [vmem:[#allocation6 + $0x218] sm:$0xff] }
 0x224   :  { %2559 = vmatpush2.bf16.msra.mxu0 %v2929_v38  ;;  %2620 = vmatpush2.bf16.msra.mxu1 %v3057_v47  ;;  %v3009_v38 = vcombine.low %v801_v45, %v805_v36  ;;  %v2874_v47 = vcombine.high %v665_v53, %v669_v54 }
 0x225   :  { %2560 = vmatprep.subr.bf16.mxu0 %v2922_v49  ;;  %2621 = vmatprep.subr.bf16.mxu1 %v3050_v50  ;;  %v3002_v49 = vcombine.high %v793_v56, %v797_v46  ;;  %v2873_v50 = vcombine.low %v665_v53, %v669_v54 }
 0x228   :  { %2561 = vmatpush2.bf16.msra.mxu0 %v2921_v63  ;;  %2622 = vmatpush2.bf16.msra.mxu1 %v3049_v0  ;;  %v3484_v0 = vld [vmem:[%s3522_s7] sm:$0xff]  ;;  %s3206_s7 = smov [#allocation8]  }
 0x229   :  { %2562 = vmatprep.subr.bf16.mxu0 %v2914_v2  ;;  %2623 = vmatprep.subr.bf16.mxu1 %v3042_v3  ;;  %v859_v3 = vrot.slane %v3484_v0, %v250_v48  ;;  %s2750_s6 = sshll.u32 %s3206_s7, 4  ;;  %s2751_s6 = int_to_ptr.vmem [resolvable:$true] %s2750_s6 }
 0x22a   :  { %s3171_s20 = scalar_lea.vmem %s2751_s6, 1024  ;;  %p3176_p11 = scmp.lt.s32.totalorder %s2751_s6, %s2751_s6 }
 0x22b   :  { %p3172_p10 = scmp.ne.s32.totalorder %s2751_s6, %s3171_s20  ;;  %p3177_p12 = scmp.lt.s32.totalorder %s3171_s20, %s3171_s20 }
 0x22c   :  { %2563 = vmatpush2.bf16.msra.mxu0 %v2913_v8  ;;  %2624 = vmatpush2.bf16.msra.mxu1 %v3041_v10 }
 0x22d   :  { %2564 = vmatprep.subr.bf16.mxu0 %v2906_v11  ;;  %2625 = vmatprep.subr.bf16.mxu1 %v3034_v12  ;;  %p3178_p13 = por %p3177_p12, %p3176_p11 }
 0x22f   :  { %p3179_p0 = pnand %p3178_p13, %p3172_p10 }
 0x230   :  { %2565 = vmatpush2.bf16.msra.mxu0 %v2905_v21  ;;  %2626 = vmatpush2.bf16.msra.mxu1 %v3033_v22 }
 0x231   :  { %2566 = vmatprep.subr.bf16.mxu0 %v2898_v23  ;;  %2627 = vmatprep.subr.bf16.mxu1 %v3026_v26 }
 0x234   :  { %2567 = vmatpush2.bf16.msra.mxu0 %v2897_v31  ;;  %2628 = vmatpush2.bf16.msra.mxu1 %v3025_v34 }
 0x235   :  { %2568 = vmatprep.subr.bf16.mxu0 %v2890_v44  ;;  %2629 = vmatprep.subr.bf16.mxu1 %v3018_v16 }
 0x238   :  { %2569 = vmatpush2.bf16.msra.mxu0 %v2889_v39  ;;  %2630 = vmatpush2.bf16.msra.mxu1 %v3017_v40 }
 0x239   :  { %2570 = vmatprep.subr.bf16.mxu0 %v2882_v55  ;;  %2631 = vmatprep.subr.bf16.mxu1 %v3010_v52 }
 0x23c   :  { %2571 = vmatpush2.bf16.msra.mxu0 %v2881_v33  ;;  %2632 = vmatpush2.bf16.msra.mxu1 %v3009_v38 }
 0x23d   :  { %2572 = vmatprep.subr.bf16.mxu0 %v2874_v47  ;;  %2633 = vmatprep.subr.bf16.mxu1 %v3002_v49 }
 0x240   :  { %2573 = vmatpush2.bf16.msra.mxu0 %v2873_v50  ;;  %2634 = vmatpush2.bf16.msra.mxu1 %v3001_v57 }
 0x241   :  { %v2210_v58 = vpop.f32.mrf.mxu0  ;;  %v2271_v61 = vpop.f32.mrf.mxu1 }
 0x243   :  { %2575 = vmatmul.mubr.bf16.vlgmr.msra.gmra.mxu0 %v3396_v18  ;;  %2636 = vmatmul.mubr.bf16.vlgmr.msra.gmra.mxu1 %v3398_v19  ;;  %v2212_v62 = vpop.f32.mrf.mxu0  ;;  %v2273_v63 = vpop.f32.mrf.mxu1  ;;  %v863_v19 = vrot.slane %v3484_v0, %v254_v42 }
 0x244   :  { %2584 = vmatprep.mubr.bf16.mxu0 %v3429_v24  ;;  %2645 = vmatprep.mubr.bf16.mxu1 %v3431_v25  ;;  %v2211_v25 = vadd.f32 %v2210_v58, %v859_v3 }
 0x245   :  { %v2214_v2 = vpop.f32.mrf.mxu0  ;;  %v2275_v4 = vpop.f32.mrf.mxu1  ;;  %v2213_v7 = vadd.f32 %v2212_v62, %v863_v19 }
 0x246   :  { %v2215_v24 = vadd.f32 %v2214_v2, %v859_v3  ;;  %v2272_v12 = vadd.f32 %v2271_v61, %v2211_v25 }
 0x247   :  { %v2216_v18 = vpop.f32.mrf.mxu0  ;;  %v2277_v6 = vpop.f32.mrf.mxu1  ;;  %v2274_v1 = vadd.f32 %v2273_v63, %v2213_v7 }
 0x248   :  { %v2217_v5 = vadd.f32 %v2216_v18, %v863_v19  ;;  %v2276_v48 = vadd.f32 %v2275_v4, %v2215_v24  ;;  %v2664_v23 = vmax.f32 %v2272_v12, 0.0  ;;  %v867_v4 = vrot.slane %v3484_v0, %v258_v51 }
 0x249   :  { %v2665_v34 = vmax.f32 %v2274_v1, 0.0  ;;  %v871_v24 = vrot.slane %v3484_v0, %v262_v43 }
 0x24a   :  { %v2278_v13 = vadd.f32 %v2277_v6, %v2217_v5 }
 0x24b   :  { %2585 = vmatmul.mubr.bf16.gmra.mxu0 %v3423_v9  ;;  %2646 = vmatmul.mubr.bf16.gmra.mxu1 %v3425_v20  ;;  %v2672_v20 = vmax.f32 %v2276_v48, 0.0 }
 0x24c   :  { %2594 = vmatprep.mubr.bf16.mxu0 %v3437_v32  ;;  %2655 = vmatprep.mubr.bf16.mxu1 %v3441_v37  ;;  %v2673_v26 = vmax.f32 %v2278_v13, 0.0 }
 0x24d   :  { %v2704_v44 = vmax.f32 %v2664_v23, %v2672_v20 }
 0x24f   :  { %v2220_v8 = vpop.f32.mrf.mxu0  ;;  %v2281_v10 = vpop.f32.mrf.mxu1 }
 0x250   :  { %v2221_v11 = vadd.f32 %v2220_v8, %v859_v3 }
 0x251   :  { %v2222_v42 = vpop.f32.mrf.mxu0  ;;  %v2283_v14 = vpop.f32.mrf.mxu1 }
 0x252   :  { %v2223_v15 = vadd.f32 %v2222_v42, %v863_v19  ;;  %v2282_v9 = vadd.f32 %v2281_v10, %v2221_v11 }
 0x253   :  { %2595 = vmatmul.mubr.bf16.gmra.mxu0 %v3444_v59  ;;  %2656 = vmatmul.mubr.bf16.gmra.mxu1 %v3446_v60  ;;  %v2224_v32 = vpop.f32.mrf.mxu0  ;;  %v2285_v37 = vpop.f32.mrf.mxu1  ;;  %v2705_v60 = vmax.f32 %v2665_v34, %v2673_v26 }
 0x254   :  { %v2225_v21 = vadd.f32 %v2224_v32, %v859_v3  ;;  %v2284_v22 = vadd.f32 %v2283_v14, %v2223_v15  ;;  %v2680_v29 = vmax.f32 %v2282_v9, 0.0 }
 0x255   :  { %v2226_v27 = vpop.f32.mrf.mxu0  ;;  %v2287_v28 = vpop.f32.mrf.mxu1 }
 0x256   :  { %v2227_v30 = vadd.f32 %v2226_v27, %v863_v19  ;;  %v2286_v31 = vadd.f32 %v2285_v37, %v2225_v21  ;;  %v2681_v35 = vmax.f32 %v2284_v22, 0.0  ;;  %v2712_v55 = vmax.f32 %v2704_v44, %v2680_v29 }
 0x257   :  { %v2230_v16 = vpop.f32.mrf.mxu0  ;;  %v2291_v17 = vpop.f32.mrf.mxu1 }
 0x258   :  { %v2688_v45 = vmax.f32 %v2286_v31, 0.0  ;;  %v2231_v59 = vadd.f32 %v2230_v16, %v859_v3  ;;  %v2288_v36 = vadd.f32 %v2287_v28, %v2227_v30  ;;  %v2713_v33 = vmax.f32 %v2705_v60, %v2681_v35 }
 0x259   :  { %v2232_v39 = vpop.f32.mrf.mxu0  ;;  %v2293_v40 = vpop.f32.mrf.mxu1 }
 0x25a   :  { %v2689_v52 = vmax.f32 %v2288_v36, 0.0  ;;  %v2233_v53 = vadd.f32 %v2232_v39, %v863_v19  ;;  %v2292_v54 = vadd.f32 %v2291_v17, %v2231_v59  ;;  %v2720_v38 = vmax.f32 %v2712_v55, %v2688_v45 }
 0x25b   :  { %v2234_v56 = vpop.f32.mrf.mxu0  ;;  %v2295_v46 = vpop.f32.mrf.mxu1 }
 0x25c   :  { %v2696_v47 = vmax.f32 %v2292_v54, 0.0  ;;  %v2294_v49 = vadd.f32 %v2293_v40, %v2233_v53  ;;  %v2721_v58 = vmax.f32 %v2713_v33, %v2689_v52 }
 0x25d   :  { %v2235_v50 = vpop.f32.mrf.mxu0  ;;  %v2296_v57 = vpop.f32.mrf.mxu1 }
 0x25e   :  { %v2728_v61 = vmax.f32 %v2720_v38, %v2696_v47  ;;  %v2697_v62 = vmax.f32 %v2294_v49, 0.0 }
 0x260   :  { %2736 = vst [vmem:[#allocation8] sm:$0xff] %v2728_v61  ;;  %v2729_v63 = vmax.f32 %v2721_v58, %v2697_v62 }
 0x262   :  { %2737 = vst [vmem:[#allocation8 + $0x8] sm:$0xff] %v2729_v63 }
 0x281   :  { %v2332_v2 = vpop.f32.mrf.mxu0  ;;  %v2393_v3 = vpop.f32.mrf.mxu1 }
 0x282   :  { %v2333_v7 = vadd.f32 %v2332_v2, %v867_v4 }
 0x283   :  { %v2334_v18 = vpop.f32.mrf.mxu0  ;;  %v2395_v19 = vpop.f32.mrf.mxu1 }
 0x284   :  { %v2335_v11 = vadd.f32 %v2334_v18, %v871_v24  ;;  %v2394_v15 = vadd.f32 %v2393_v3, %v2333_v7 }
 0x285   :  { %v2336_v25 = vpop.f32.mrf.mxu0  ;;  %v2397_v5 = vpop.f32.mrf.mxu1 }
 0x286   :  { %v2337_v6 = vadd.f32 %v2336_v25, %v867_v4  ;;  %v2396_v37 = vadd.f32 %v2395_v19, %v2335_v11  ;;  %v2666_v27 = vmax.f32 %v2394_v15, 0.0 }
 0x287   :  { %v2338_v48 = vpop.f32.mrf.mxu0  ;;  %v2399_v8 = vpop.f32.mrf.mxu1 }
 0x288   :  { %v2339_v10 = vadd.f32 %v2338_v48, %v871_v24  ;;  %v2398_v12 = vadd.f32 %v2397_v5, %v2337_v6  ;;  %v2667_v16 = vmax.f32 %v2396_v37, 0.0 }
 0x289   :  { %v2342_v13 = vpop.f32.mrf.mxu0  ;;  %v2403_v42 = vpop.f32.mrf.mxu1 }
 0x28a   :  { %v2343_v14 = vadd.f32 %v2342_v13, %v867_v4  ;;  %v2400_v51 = vadd.f32 %v2399_v8, %v2339_v10  ;;  %v2674_v43 = vmax.f32 %v2398_v12, 0.0 }
 0x28b   :  { %v2344_v9 = vpop.f32.mrf.mxu0  ;;  %v2405_v1 = vpop.f32.mrf.mxu1 }
 0x28c   :  { %v2404_v20 = vadd.f32 %v2403_v42, %v2343_v14  ;;  %v2345_v32 = vadd.f32 %v2344_v9, %v871_v24  ;;  %v2675_v28 = vmax.f32 %v2400_v51, 0.0  ;;  %v2706_v17 = vmax.f32 %v2666_v27, %v2674_v43 }
 0x28d   :  { %v2346_v21 = vpop.f32.mrf.mxu0  ;;  %v2407_v22 = vpop.f32.mrf.mxu1 }
 0x28e   :  { %v2406_v23 = vadd.f32 %v2405_v1, %v2345_v32  ;;  %v2347_v26 = vadd.f32 %v2346_v21, %v867_v4  ;;  %v2682_v31 = vmax.f32 %v2404_v20, 0.0  ;;  %v2707_v40 = vmax.f32 %v2667_v16, %v2675_v28 }
 0x28f   :  { %v2348_v29 = vpop.f32.mrf.mxu0  ;;  %v2409_v30 = vpop.f32.mrf.mxu1 }
 0x290   :  { %v2408_v34 = vadd.f32 %v2407_v22, %v2347_v26  ;;  %v2349_v44 = vadd.f32 %v2348_v29, %v871_v24  ;;  %v2683_v59 = vmax.f32 %v2406_v23, 0.0  ;;  %v2714_v53 = vmax.f32 %v2706_v17, %v2682_v31 }
 0x291   :  { %v2352_v35 = vpop.f32.mrf.mxu0  ;;  %v2413_v45 = vpop.f32.mrf.mxu1 }
 0x292   :  { %v2690_v36 = vmax.f32 %v2408_v34, 0.0  ;;  %v2410_v60 = vadd.f32 %v2409_v30, %v2349_v44  ;;  %v2353_v39 = vadd.f32 %v2352_v35, %v867_v4  ;;  %v2715_v47 = vmax.f32 %v2707_v40, %v2683_v59 }
 0x293   :  { %v2354_v55 = vpop.f32.mrf.mxu0  ;;  %v2415_v52 = vpop.f32.mrf.mxu1  ;;  %v874_v4 = vsub.s32 4, %v3359_v41 }
 0x294   :  { %v2691_v54 = vmax.f32 %v2410_v60, 0.0  ;;  %v2414_v56 = vadd.f32 %v2413_v45, %v2353_v39  ;;  %v2355_v46 = vadd.f32 %v2354_v55, %v871_v24  ;;  %v2722_v49 = vmax.f32 %v2714_v53, %v2690_v36 }
 0x295   :  { %v2356_v33 = vpop.f32.mrf.mxu0  ;;  %v2417_v38 = vpop.f32.mrf.mxu1  ;;  %v878_v24 = vsub.s32 5, %v3359_v41  ;;  %v875_v25 = vrot.slane %v3484_v0, %v874_v4 }
 0x296   :  { %v2698_v50 = vmax.f32 %v2414_v56, 0.0  ;;  %v2416_v57 = vadd.f32 %v2415_v52, %v2355_v46  ;;  %v2723_v62 = vmax.f32 %v2715_v47, %v2691_v54 }
 0x297   :  { %v2357_v58 = vpop.f32.mrf.mxu0  ;;  %v2418_v61 = vpop.f32.mrf.mxu1  ;;  %v879_v7 = vrot.slane %v3484_v0, %v878_v24 }
 0x298   :  { %v2730_v63 = vmax.f32 %v2722_v49, %v2698_v50  ;;  %v2699_v2 = vmax.f32 %v2416_v57, 0.0 }
 0x29a   :  { %2738 = vst [vmem:[#allocation8 + $0x10] sm:$0xff] %v2730_v63  ;;  %v2731_v3 = vmax.f32 %v2723_v62, %v2699_v2 }
 0x29c   :  { %2739 = vst [vmem:[#allocation8 + $0x18] sm:$0xff] %v2731_v3 }
 0x2c2   :  { %v2454_v18 = vpop.f32.mrf.mxu0  ;;  %v2515_v19 = vpop.f32.mrf.mxu1 }
 0x2c3   :  { %v2455_v11 = vadd.f32 %v2454_v18, %v875_v25 }
 0x2c4   :  { %v2456_v5 = vpop.f32.mrf.mxu0  ;;  %v2517_v6 = vpop.f32.mrf.mxu1 }
 0x2c5   :  { %v2457_v14 = vadd.f32 %v2456_v5, %v879_v7  ;;  %v2516_v20 = vadd.f32 %v2515_v19, %v2455_v11 }
 0x2c6   :  { %v2458_v48 = vpop.f32.mrf.mxu0  ;;  %v2519_v8 = vpop.f32.mrf.mxu1 }
 0x2c7   :  { %v2459_v10 = vadd.f32 %v2458_v48, %v875_v25  ;;  %v2518_v23 = vadd.f32 %v2517_v6, %v2457_v14  ;;  %v2668_v31 = vmax.f32 %v2516_v20, 0.0 }
 0x2c8   :  { %v2460_v12 = vpop.f32.mrf.mxu0  ;;  %v2521_v13 = vpop.f32.mrf.mxu1 }
 0x2c9   :  { %v2461_v42 = vadd.f32 %v2460_v12, %v879_v7  ;;  %v2520_v15 = vadd.f32 %v2519_v8, %v2459_v10  ;;  %v2669_v59 = vmax.f32 %v2518_v23, 0.0 }
 0x2ca   :  { %v2464_v51 = vpop.f32.mrf.mxu0  ;;  %v2525_v9 = vpop.f32.mrf.mxu1 }
 0x2cb   :  { %v2465_v1 = vadd.f32 %v2464_v51, %v875_v25  ;;  %v2522_v32 = vadd.f32 %v2521_v13, %v2461_v42  ;;  %v2676_v26 = vmax.f32 %v2520_v15, 0.0 }
 0x2cc   :  { %v2466_v37 = vpop.f32.mrf.mxu0  ;;  %v2527_v43 = vpop.f32.mrf.mxu1 }
 0x2cd   :  { %v2526_v21 = vadd.f32 %v2525_v9, %v2465_v1  ;;  %v2467_v22 = vadd.f32 %v2466_v37, %v879_v7  ;;  %v2677_v34 = vmax.f32 %v2522_v32, 0.0  ;;  %v2708_v36 = vmax.f32 %v2668_v31, %v2676_v26 }
 0x2ce   :  { %v2468_v27 = vpop.f32.mrf.mxu0  ;;  %v2529_v28 = vpop.f32.mrf.mxu1 }
 0x2cf   :  { %v2528_v29 = vadd.f32 %v2527_v43, %v2467_v22  ;;  %v2469_v30 = vadd.f32 %v2468_v27, %v875_v25  ;;  %v2684_v17 = vmax.f32 %v2526_v21, 0.0  ;;  %v2709_v54 = vmax.f32 %v2669_v59, %v2677_v34 }
 0x2d0   :  { %v2470_v44 = vpop.f32.mrf.mxu0  ;;  %v2531_v16 = vpop.f32.mrf.mxu1 }
 0x2d1   :  { %v2530_v35 = vadd.f32 %v2529_v28, %v2469_v30  ;;  %v2471_v45 = vadd.f32 %v2470_v44, %v879_v7  ;;  %v2685_v40 = vmax.f32 %v2528_v29, 0.0  ;;  %v2716_v33 = vmax.f32 %v2708_v36, %v2684_v17 }
 0x2d2   :  { %v2474_v60 = vpop.f32.mrf.mxu0  ;;  %v2535_v39 = vpop.f32.mrf.mxu1 }
 0x2d3   :  { %v2692_v55 = vmax.f32 %v2530_v35, 0.0  ;;  %v2532_v52 = vadd.f32 %v2531_v16, %v2471_v45  ;;  %v2475_v53 = vadd.f32 %v2474_v60, %v875_v25  ;;  %v2717_v58 = vmax.f32 %v2709_v54, %v2685_v40 }
 0x2d4   :  { %v2476_v56 = vpop.f32.mrf.mxu0  ;;  %v2537_v46 = vpop.f32.mrf.mxu1  ;;  %v882_v25 = vsub.s32 6, %v3359_v41 }
 0x2d5   :  { %v2693_v38 = vmax.f32 %v2532_v52, 0.0  ;;  %v2536_v47 = vadd.f32 %v2535_v39, %v2475_v53  ;;  %v2477_v49 = vadd.f32 %v2476_v56, %v879_v7  ;;  %v2724_v61 = vmax.f32 %v2716_v33, %v2692_v55 }
 0x2d6   :  { %v2478_v50 = vpop.f32.mrf.mxu0  ;;  %v2539_v57 = vpop.f32.mrf.mxu1  ;;  %v886_v7 = vsub.s32 7, %v3359_v41  ;;  %v883_v48 = vrot.slane %v3484_v0, %v882_v25 }
 0x2d7   :  { %v2700_v62 = vmax.f32 %v2536_v47, 0.0  ;;  %v2538_v63 = vadd.f32 %v2537_v46, %v2477_v49  ;;  %v2725_v4 = vmax.f32 %v2717_v58, %v2693_v38 }
 0x2d8   :  { %v2479_v2 = vpop.f32.mrf.mxu0  ;;  %v2540_v3 = vpop.f32.mrf.mxu1  ;;  %v887_v11 = vrot.slane %v3484_v0, %v886_v7 }
 0x2d9   :  { %v2732_v18 = vmax.f32 %v2724_v61, %v2700_v62  ;;  %v2701_v19 = vmax.f32 %v2538_v63, 0.0 }
 0x2db   :  { %2740 = vst [vmem:[#allocation8 + $0x20] sm:$0xff] %v2732_v18  ;;  %v2733_v24 = vmax.f32 %v2725_v4, %v2701_v19 }
 0x2dd   :  { %2741 = vst [vmem:[#allocation8 + $0x28] sm:$0xff] %v2733_v24 }
 0x303   :  { %v2576_v5 = vpop.f32.mrf.mxu0  ;;  %v2637_v6 = vpop.f32.mrf.mxu1 }
 0x304   :  { %v2577_v14 = vadd.f32 %v2576_v5, %v883_v48 }
 0x305   :  { %v2578_v8 = vpop.f32.mrf.mxu0  ;;  %v2639_v10 = vpop.f32.mrf.mxu1 }
 0x306   :  { %v2579_v1 = vadd.f32 %v2578_v8, %v887_v11  ;;  %v2638_v21 = vadd.f32 %v2637_v6, %v2577_v14 }
 0x307   :  { %v2580_v12 = vpop.f32.mrf.mxu0  ;;  %v2641_v13 = vpop.f32.mrf.mxu1 }
 0x308   :  { %v2581_v42 = vadd.f32 %v2580_v12, %v883_v48  ;;  %v2640_v28 = vadd.f32 %v2639_v10, %v2579_v1  ;;  %v2670_v44 = vmax.f32 %v2638_v21, 0.0 }
 0x309   :  { %v2582_v15 = vpop.f32.mrf.mxu0  ;;  %v2643_v51 = vpop.f32.mrf.mxu1 }
 0x30a   :  { %v2583_v9 = vadd.f32 %v2582_v15, %v887_v11  ;;  %v2642_v20 = vadd.f32 %v2641_v13, %v2581_v42  ;;  %v2671_v60 = vmax.f32 %v2640_v28, 0.0 }
 0x30b   :  { %v2586_v32 = vpop.f32.mrf.mxu0  ;;  %v2647_v37 = vpop.f32.mrf.mxu1 }
 0x30c   :  { %v2587_v43 = vadd.f32 %v2586_v32, %v883_v48  ;;  %v2644_v41 = vadd.f32 %v2643_v51, %v2583_v9  ;;  %v2678_v0 = vmax.f32 %v2642_v20, 0.0 }
 0x30d   :  { %v2588_v22 = vpop.f32.mrf.mxu0  ;;  %v2649_v23 = vpop.f32.mrf.mxu1 }
 0x30e   :  { %v2648_v26 = vadd.f32 %v2647_v37, %v2587_v43  ;;  %v2589_v27 = vadd.f32 %v2588_v22, %v887_v11  ;;  %v2679_v16 = vmax.f32 %v2644_v41, 0.0  ;;  %v2710_v39 = vmax.f32 %v2670_v44, %v2678_v0 }
 0x30f   :  { %v2590_v29 = vpop.f32.mrf.mxu0  ;;  %v2651_v30 = vpop.f32.mrf.mxu1 }
 0x310   :  { %v2650_v31 = vadd.f32 %v2649_v23, %v2589_v27  ;;  %v2591_v34 = vadd.f32 %v2590_v29, %v883_v48  ;;  %v2686_v45 = vmax.f32 %v2648_v26, 0.0  ;;  %v2711_v46 = vmax.f32 %v2671_v60, %v2679_v16 }
 0x311   :  { %v2592_v17 = vpop.f32.mrf.mxu0  ;;  %v2653_v35 = vpop.f32.mrf.mxu1 }
 0x312   :  { %v2652_v59 = vadd.f32 %v2651_v30, %v2591_v34  ;;  %v2593_v36 = vadd.f32 %v2592_v17, %v887_v11  ;;  %v2687_v52 = vmax.f32 %v2650_v31, 0.0  ;;  %v2718_v47 = vmax.f32 %v2710_v39, %v2686_v45 }
 0x313   :  { %v2596_v40 = vpop.f32.mrf.mxu0  ;;  %v2657_v55 = vpop.f32.mrf.mxu1 }
 0x314   :  { %v2694_v53 = vmax.f32 %v2652_v59, 0.0  ;;  %v2654_v54 = vadd.f32 %v2653_v35, %v2593_v36  ;;  %v2597_v56 = vadd.f32 %v2596_v40, %v883_v48  ;;  %v2719_v62 = vmax.f32 %v2711_v46, %v2687_v52 }
 0x315   :  { %v2598_v33 = vpop.f32.mrf.mxu0  ;;  %v2659_v38 = vpop.f32.mrf.mxu1 }
 0x316   :  { %v2695_v49 = vmax.f32 %v2654_v54, 0.0  ;;  %v2658_v50 = vadd.f32 %v2657_v55, %v2597_v56  ;;  %v2599_v57 = vadd.f32 %v2598_v33, %v887_v11  ;;  %v2726_v63 = vmax.f32 %v2718_v47, %v2694_v53 }
 0x317   :  { %v2600_v58 = vpop.f32.mrf.mxu0  ;;  %v2661_v61 = vpop.f32.mrf.mxu1 }
 0x318   :  { %v2702_v2 = vmax.f32 %v2658_v50, 0.0  ;;  %v2660_v3 = vadd.f32 %v2659_v38, %v2599_v57  ;;  %v2727_v19 = vmax.f32 %v2719_v62, %v2695_v49 }
 0x319   :  { %v2601_v4 = vpop.f32.mrf.mxu0  ;;  %v2662_v18 = vpop.f32.mrf.mxu1 }
 0x31a   :  { %v2734_v24 = vmax.f32 %v2726_v63, %v2702_v2  ;;  %v2703_v25 = vmax.f32 %v2660_v3, 0.0 }
 0x31c   :  { %2742 = vst [vmem:[#allocation8 + $0x30] sm:$0xff] %v2734_v24  ;;  %v2735_v5 = vmax.f32 %v2727_v19, %v2703_v25 }
 0x31e   :  { %2743 = vst [vmem:[#allocation8 + $0x38] sm:$0xff] %v2735_v5 }
 0x31f   :  { %3182 = shalt.err (!%p3179_p0)
}
 0x320   :  { %2753 = dma.vmem_to_hbm [thread:$0]  %s2751_s6, 1024, %s3523_s8, [#allocation5]  }
 0x321   :  { %3195 = dma.done.wait [#allocation5], 1024  }
 0x322   :  { %3196 = vsyncadd [#allocation5], 4294966272 }
 0x323   :  { %2757 = vsyncpa [#allocation4], 1 }
 0x324   :  { %2758 = vsyncpa [#allocation7], 1 }
 0x325   :  { %2759 = vsyncpa [#allocation5], 1 }

</bundles_post_ra>
